<compile_context>
chip_gen: v5e
topology: v5e:2x2
jax: 0.10.0
libtpu: 0.0.40
codegen_flags: <defaults>
</compile_context>

<pallas_src>
import functools
import math

import jax
import jax.numpy as jnp
import numpy as np
from jax import lax
from jax.experimental import pallas as pl
from jax.experimental.pallas import tpu as pltpu


# dot_general dimension numbers for 2-D operands.
_NN = (((1,), (0,)), ((), ()))   # A   @ B
_TN = (((0,), (0,)), ((), ()))   # A.T @ B     (LHS transposed)


def _attention_kernel(x_ref, wqkv_ref, bqkv_ref, wo_ref, bo_ref, o_ref,
                      attn_ref, *, n_embd, n_head, q_block):
    """One grid step == one batch element, channel-major layout.

    x_ref:    (1, C, S)   channels x tokens for this batch element (f32)
    wqkv_ref: (3C, C)     fused QKV weight, PyTorch (out_f, in_f) layout, bf16
                          (Q rows pre-scaled by log2(e)/sqrt(dh))
    bqkv_ref: (3C, 1)     fused QKV bias (Q rows pre-scaled), f32
    wo_ref:   (C, C)      output projection weight, bf16
    bo_ref:   (C, 1)      output projection bias, f32
    o_ref:    (1, C, S)   residual + attention output (same layout as input)
    attn_ref: (C, S)      bf16 VMEM scratch holding the per-head outputs
    """
    C = n_embd
    dh = C // n_head
    S = x_ref.shape[-1]
    nq = S // q_block

    x = x_ref[0]                                               # (C, S) f32
    x_bf = x.astype(jnp.bfloat16)

    # Fused QKV projection: one (3C, C) x (C, S) MXU pass, f32 accumulation.
    qkv = jnp.dot(wqkv_ref[...], x_bf,
                  preferred_element_type=jnp.float32) + bqkv_ref[...]  # (3C, S)
    qkv = qkv.astype(jnp.bfloat16)

    for h in range(n_head):
        # Sublane row-slices of the fused result (free views for dh % 8 == 0).
        q = qkv[0 * C + h * dh:0 * C + (h + 1) * dh, :]        # (dh, S) bf16
        k = qkv[1 * C + h * dh:1 * C + (h + 1) * dh, :]        # (dh, S) bf16
        v = qkv[2 * C + h * dh:2 * C + (h + 1) * dh, :]        # (dh, S) bf16

        for qb in range(nq):
            qs = qb * q_block
            q_blk = q[:, qs:qs + q_block]                      # (dh, TQ)

            # Key-major scores: s_t[j, i] = sum_d k[d, j] * q_scaled[d, i]
            # (log2(e)/sqrt(dh) already folded into q via Wq/bq).
            s_t = lax.dot_general(k, q_blk, _TN,
                                  preferred_element_type=jnp.float32)  # (S, TQ)

            # Numerically-stable unnormalized softmax in the exp2 domain;
            # reductions land directly on a (1, TQ) lane vector.
            m = jnp.max(s_t, axis=0, keepdims=True)            # (1, TQ) f32
            e = jnp.exp2(s_t - m)                              # (S, TQ) f32
            l = jnp.sum(e, axis=0, keepdims=True)              # (1, TQ) f32
            p = e.astype(jnp.bfloat16)                         # MXU operand

            # o[d, i] = (sum_j v[d, j] * p[j, i]) / l[i]  (deferred normalize)
            o_blk = lax.dot_general(v, p, _NN,
                                    preferred_element_type=jnp.float32)  # (dh, TQ)
            o_blk = o_blk * pl.reciprocal(l, approx=False)
            attn_ref[h * dh:(h + 1) * dh, qs:qs + q_block] = (
                o_blk.astype(jnp.bfloat16))

    # Output projection (channel-major) + fused residual.
    # Last dim S is lane-dense -> unmasked vector stores.
    out = jnp.dot(wo_ref[...], attn_ref[...],
                  preferred_element_type=jnp.float32) + bo_ref[...]
    o_ref[0] = (x + out).astype(o_ref.dtype)


def altan_attention(x_nchw, wqkv, bqkv, wout, bout, *, n_head=1):
    """Pallas implementation of AltanAttention.forward. x_nchw: (B, C, H, W)."""
    B, C, H, W = x_nchw.shape
    S = H * W
    assert C % n_head == 0
    dh = C // n_head

    # Free reshape (contiguous): (B, C, H, W) -> (B, C, S). No HBM transpose.
    x_bcs = x_nchw.reshape(B, C, S)

    # One-time parameter prep (tiny, reused for every grid step):
    #   * fold both the 1/sqrt(dh) attention scale AND log2(e) (for exp2)
    #     into the Q rows of the fused weight/bias,
    #   * biases as (·, 1) columns for lane-broadcast inside the kernel,
    #   * weights cast to bf16 once here (halves weight DMA, bf16 MXU path).
    scale = math.log2(math.e) / math.sqrt(dh)
    wqkv_s = wqkv.at[:C, :].multiply(scale).astype(jnp.bfloat16)      # (3C, C)
    bqkv_s = bqkv.at[:C].multiply(scale).reshape(3 * C, 1)            # (3C, 1) f32
    wout_b = wout.astype(jnp.bfloat16)                                # (C, C)
    bo = bout.reshape(C, 1)                                           # (C, 1) f32

    # Query-column block: keeps the live (S, TQ) score block small.
    q_block = 128 if S % 128 == 0 else S

    kernel = functools.partial(_attention_kernel, n_embd=C, n_head=n_head,
                               q_block=q_block)

    out_bcs = pl.pallas_call(
        kernel,
        out_shape=jax.ShapeDtypeStruct((B, C, S), x_nchw.dtype),
        grid_spec=pltpu.PrefetchScalarGridSpec(
            num_scalar_prefetch=0,
            grid=(B,),
            in_specs=[
                pl.BlockSpec((1, C, S), lambda b: (b, 0, 0)),      # x (channel-major)
                pl.BlockSpec((3 * C, C), lambda b: (0, 0)),        # fused Wqkv (bf16)
                pl.BlockSpec((3 * C, 1), lambda b: (0, 0)),        # fused bqkv
                pl.BlockSpec((C, C), lambda b: (0, 0)),            # Wout (bf16)
                pl.BlockSpec((C, 1), lambda b: (0, 0)),            # bout
            ],
            out_specs=pl.BlockSpec((1, C, S), lambda b: (b, 0, 0)),
            scratch_shapes=[pltpu.VMEM((C, S), jnp.bfloat16)],     # head assembly
        ),
        compiler_params=pltpu.CompilerParams(
            dimension_semantics=("parallel",)),
    )(x_bcs, wqkv_s, bqkv_s, wout_b, bo)

    # Free reshape back: (B, C, S) -> (B, C, H, W).
    return out_bcs.reshape(B, C, H, W)


def _reference(x, wqkv, bqkv, wout, bout, n_head):
    """Plain-JAX (f32) mirror of the PyTorch forward, for correctness check."""
    B, C, H, W = x.shape
    S = H * W
    dh = C // n_head
    t = jnp.transpose(x.reshape(B, C, S), (0, 2, 1))              # (B, S, C)
    qkv = t @ wqkv.T + bqkv
    q, k, v = jnp.split(qkv, 3, axis=-1)
    q = q.reshape(B, S, n_head, dh).transpose(0, 2, 1, 3)
    k = k.reshape(B, S, n_head, dh).transpose(0, 2, 1, 3)
    v = v.reshape(B, S, n_head, dh).transpose(0, 2, 1, 3)
    s = (q @ jnp.swapaxes(k, -1, -2)) / math.sqrt(dh)
    p = jax.nn.softmax(s, axis=-1)
    o = (p @ v).transpose(0, 2, 1, 3).reshape(B, S, C)
    o = o @ wout.T + bout
    o = jnp.transpose(o, (0, 2, 1)).reshape(B, C, H, W)
    return x + o


if __name__ == "__main__":
    B, C, H, W = 2, 32, 16, 16      # n_embd = 32, tokens S = 256 (lane-dense)
    n_head = 1                      # module default

    key = jax.random.PRNGKey(0)
    kx, k1, k2, k3, k4 = jax.random.split(key, 5)

    x = jax.random.normal(kx, (B, C, H, W), dtype=jnp.float32)
    # Deterministic synthetic parameters (PyTorch Linear layout: (out_f, in_f)).
    wqkv = 0.05 * jax.random.normal(k1, (3 * C, C), dtype=jnp.float32)
    bqkv = 0.05 * jax.random.normal(k2, (3 * C,), dtype=jnp.float32)
    wout = 0.05 * jax.random.normal(k3, (C, C), dtype=jnp.float32)
    bout = 0.05 * jax.random.normal(k4, (C,), dtype=jnp.float32)

    out = altan_attention(x, wqkv, bqkv, wout, bout, n_head=n_head)
    out = jax.block_until_ready(out)

    ref = jax.block_until_ready(_reference(x, wqkv, bqkv, wout, bout, n_head))
    # Tolerance loosened vs v1 because MXU operands are now bf16 (f32 accum),
    # per the perf review; residual-dominated output keeps errors well inside.
    np.testing.assert_allclose(np.asarray(out), np.asarray(ref),
                               rtol=2e-2, atol=2e-2)
    print("KERNEL_OK")
</pallas_src>

<mosaic_0001>
module attributes {stable_mosaic.version = 11 : i64} {
  func.func @_attention_kernel(%arg0: i32, %arg1: memref<1x32x256xf32, #tpu.memory_space<vmem>>, %arg2: memref<96x32xbf16, #tpu.memory_space<vmem>>, %arg3: memref<96x1xf32, #tpu.memory_space<vmem>>, %arg4: memref<32x32xbf16, #tpu.memory_space<vmem>>, %arg5: memref<32x1xf32, #tpu.memory_space<vmem>>, %arg6: memref<1x32x256xf32, #tpu.memory_space<vmem>>, %arg7: memref<32x256xbf16, #tpu.memory_space<vmem>>) attributes {dimension_semantics = [#tpu.dimension_semantics<parallel>], iteration_bounds = array<i64: 2>, scalar_prefetch = 0 : i64, scratch_operands = 1 : i64, tpu.core_type = #tpu.core_type<tc>, window_params = [{transform_indices = @transform_0, window_bounds = array<i64: 1, 32, 256>}, {pipeline_mode = #tpu.pipeline_mode<synchronous>, transform_indices = @transform_1, window_bounds = array<i64: 96, 32>}, {pipeline_mode = #tpu.pipeline_mode<synchronous>, transform_indices = @transform_2, window_bounds = array<i64: 96, 1>}, {pipeline_mode = #tpu.pipeline_mode<synchronous>, transform_indices = @transform_3, window_bounds = array<i64: 32, 32>}, {pipeline_mode = #tpu.pipeline_mode<synchronous>, transform_indices = @transform_4, window_bounds = array<i64: 32, 1>}, {transform_indices = @transform_5, window_bounds = array<i64: 1, 32, 256>}]} {
    %c0 = arith.constant 0 : index
    %c0_0 = arith.constant 0 : index
    %c0_1 = arith.constant 0 : index
    %0 = vector.load %arg1[%c0, %c0_0, %c0_1] : memref<1x32x256xf32, #tpu.memory_space<vmem>>, vector<1x32x256xf32>
    %1 = vector.shape_cast %0 : vector<1x32x256xf32> to vector<32x256xf32>
    %2 = arith.truncf %1 : vector<32x256xf32> to vector<32x256xbf16>
    %c0_2 = arith.constant 0 : index
    %c0_3 = arith.constant 0 : index
    %3 = vector.load %arg2[%c0_2, %c0_3] : memref<96x32xbf16, #tpu.memory_space<vmem>>, vector<96x32xbf16>
    %cst = arith.constant dense<0.000000e+00> : vector<96x256xf32>
    %4 = tpu.matmul %3, %2, %cst {dimension_numbers = #tpu.dot_dimension_numbers<[1], [0], [0], [1], [0, 0, 1, 1], [], []>} : vector<96x32xbf16>, vector<32x256xbf16>, vector<96x256xf32> -> vector<96x256xf32>
    %c0_4 = arith.constant 0 : index
    %c0_5 = arith.constant 0 : index
    %5 = vector.load %arg3[%c0_4, %c0_5] : memref<96x1xf32, #tpu.memory_space<vmem>>, vector<96x1xf32>
    %6 = vector.broadcast %5 : vector<96x1xf32> to vector<96x256xf32>
    %7 = arith.addf %4, %6 : vector<96x256xf32>
    %8 = arith.truncf %7 : vector<96x256xf32> to vector<96x256xbf16>
    %9 = vector.extract_strided_slice %8 {offsets = [0, 0], sizes = [32, 256], strides = [1, 1]} : vector<96x256xbf16> to vector<32x256xbf16>
    %10 = vector.extract_strided_slice %8 {offsets = [32, 0], sizes = [32, 256], strides = [1, 1]} : vector<96x256xbf16> to vector<32x256xbf16>
    %11 = vector.extract_strided_slice %8 {offsets = [64, 0], sizes = [32, 256], strides = [1, 1]} : vector<96x256xbf16> to vector<32x256xbf16>
    %12 = vector.extract_strided_slice %9 {offsets = [0, 0], sizes = [32, 128], strides = [1, 1]} : vector<32x256xbf16> to vector<32x128xbf16>
    %cst_6 = arith.constant dense<0.000000e+00> : vector<256x128xf32>
    %13 = tpu.matmul %10, %12, %cst_6 {dimension_numbers = #tpu.dot_dimension_numbers<[0], [0], [1], [1], [0, 1, 1, 1], [], []>} : vector<32x256xbf16>, vector<32x128xbf16>, vector<256x128xf32> -> vector<256x128xf32>
    %cst_7 = arith.constant dense<0xFF800000> : vector<128xf32>
    %14 = vector.multi_reduction <maximumf>, %13, %cst_7 [0] : vector<256x128xf32> to vector<128xf32>
    %15 = vector.shape_cast %14 : vector<128xf32> to vector<1x128xf32>
    %16 = vector.broadcast %15 : vector<1x128xf32> to vector<256x128xf32>
    %17 = arith.subf %13, %16 : vector<256x128xf32>
    %18 = math.exp2 %17 : vector<256x128xf32>
    %cst_8 = arith.constant dense<0.000000e+00> : vector<128xf32>
    %19 = vector.multi_reduction <add>, %18, %cst_8 [0] : vector<256x128xf32> to vector<128xf32>
    %20 = vector.shape_cast %19 : vector<128xf32> to vector<1x128xf32>
    %21 = arith.truncf %18 : vector<256x128xf32> to vector<256x128xbf16>
    %cst_9 = arith.constant dense<0.000000e+00> : vector<32x128xf32>
    %22 = tpu.matmul %11, %21, %cst_9 {dimension_numbers = #tpu.dot_dimension_numbers<[1], [0], [0], [1], [0, 0, 1, 1], [], []>} : vector<32x256xbf16>, vector<256x128xbf16>, vector<32x128xf32> -> vector<32x128xf32>
    %23 = tpu.reciprocal %20 : vector<1x128xf32> -> vector<1x128xf32>
    %24 = vector.broadcast %23 : vector<1x128xf32> to vector<32x128xf32>
    %25 = arith.mulf %22, %24 : vector<32x128xf32>
    %26 = arith.truncf %25 : vector<32x128xf32> to vector<32x128xbf16>
    %c0_10 = arith.constant 0 : index
    %c0_11 = arith.constant 0 : index
    %27 = vector.load %arg7[%c0_10, %c0_11] : memref<32x256xbf16, #tpu.memory_space<vmem>>, vector<32x128xbf16>
    tpu.vector_store %arg7[%c0_10, %c0_11], %26 {strides = array<i32>} : memref<32x256xbf16, #tpu.memory_space<vmem>>, vector<32x128xbf16>,
    %28 = vector.extract_strided_slice %9 {offsets = [0, 128], sizes = [32, 128], strides = [1, 1]} : vector<32x256xbf16> to vector<32x128xbf16>
    %cst_12 = arith.constant dense<0.000000e+00> : vector<256x128xf32>
    %29 = tpu.matmul %10, %28, %cst_12 {dimension_numbers = #tpu.dot_dimension_numbers<[0], [0], [1], [1], [0, 1, 1, 1], [], []>} : vector<32x256xbf16>, vector<32x128xbf16>, vector<256x128xf32> -> vector<256x128xf32>
    %cst_13 = arith.constant dense<0xFF800000> : vector<128xf32>
    %30 = vector.multi_reduction <maximumf>, %29, %cst_13 [0] : vector<256x128xf32> to vector<128xf32>
    %31 = vector.shape_cast %30 : vector<128xf32> to vector<1x128xf32>
    %32 = vector.broadcast %31 : vector<1x128xf32> to vector<256x128xf32>
    %33 = arith.subf %29, %32 : vector<256x128xf32>
    %34 = math.exp2 %33 : vector<256x128xf32>
    %cst_14 = arith.constant dense<0.000000e+00> : vector<128xf32>
    %35 = vector.multi_reduction <add>, %34, %cst_14 [0] : vector<256x128xf32> to vector<128xf32>
    %36 = vector.shape_cast %35 : vector<128xf32> to vector<1x128xf32>
    %37 = arith.truncf %34 : vector<256x128xf32> to vector<256x128xbf16>
    %cst_15 = arith.constant dense<0.000000e+00> : vector<32x128xf32>
    %38 = tpu.matmul %11, %37, %cst_15 {dimension_numbers = #tpu.dot_dimension_numbers<[1], [0], [0], [1], [0, 0, 1, 1], [], []>} : vector<32x256xbf16>, vector<256x128xbf16>, vector<32x128xf32> -> vector<32x128xf32>
    %39 = tpu.reciprocal %36 : vector<1x128xf32> -> vector<1x128xf32>
    %40 = vector.broadcast %39 : vector<1x128xf32> to vector<32x128xf32>
    %41 = arith.mulf %38, %40 : vector<32x128xf32>
    %42 = arith.truncf %41 : vector<32x128xf32> to vector<32x128xbf16>
    %c0_16 = arith.constant 0 : index
    %c128 = arith.constant 128 : index
    %43 = vector.load %arg7[%c0_16, %c128] : memref<32x256xbf16, #tpu.memory_space<vmem>>, vector<32x128xbf16>
    tpu.vector_store %arg7[%c0_16, %c128], %42 {strides = array<i32>} : memref<32x256xbf16, #tpu.memory_space<vmem>>, vector<32x128xbf16>,
    %c0_17 = arith.constant 0 : index
    %c0_18 = arith.constant 0 : index
    %44 = vector.load %arg4[%c0_17, %c0_18] : memref<32x32xbf16, #tpu.memory_space<vmem>>, vector<32x32xbf16>
    %c0_19 = arith.constant 0 : index
    %c0_20 = arith.constant 0 : index
    %45 = vector.load %arg7[%c0_19, %c0_20] : memref<32x256xbf16, #tpu.memory_space<vmem>>, vector<32x256xbf16>
    %cst_21 = arith.constant dense<0.000000e+00> : vector<32x256xf32>
    %46 = tpu.matmul %44, %45, %cst_21 {dimension_numbers = #tpu.dot_dimension_numbers<[1], [0], [0], [1], [0, 0, 1, 1], [], []>} : vector<32x32xbf16>, vector<32x256xbf16>, vector<32x256xf32> -> vector<32x256xf32>
    %c0_22 = arith.constant 0 : index
    %c0_23 = arith.constant 0 : index
    %47 = vector.load %arg5[%c0_22, %c0_23] : memref<32x1xf32, #tpu.memory_space<vmem>>, vector<32x1xf32>
    %48 = vector.broadcast %47 : vector<32x1xf32> to vector<32x256xf32>
    %49 = arith.addf %46, %48 : vector<32x256xf32>
    %50 = arith.addf %1, %49 : vector<32x256xf32>
    %c0_24 = arith.constant 0 : index
    %c0_25 = arith.constant 0 : index
    %c0_26 = arith.constant 0 : index
    %51 = vector.load %arg6[%c0_24, %c0_25, %c0_26] : memref<1x32x256xf32, #tpu.memory_space<vmem>>, vector<1x32x256xf32>
    %52 = vector.shape_cast %51 : vector<1x32x256xf32> to vector<32x256xf32>
    %53 = vector.shape_cast %50 : vector<32x256xf32> to vector<1x32x256xf32>
    tpu.vector_store %arg6[%c0_24, %c0_25, %c0_26], %53 {strides = array<i32>} : memref<1x32x256xf32, #tpu.memory_space<vmem>>, vector<1x32x256xf32>,
    return
  }
  func.func @transform_0(%arg0: i32) -> (i32, i32, i32) {
    %c0_i32 = arith.constant 0 : i32
    %c0_i32_0 = arith.constant 0 : i32
    %c0_i32_1 = arith.constant 0 : i32
    return %arg0, %c0_i32, %c0_i32_0 : i32, i32, i32
  }
  func.func @transform_1(%arg0: i32) -> (i32, i32) {
    %c0_i32 = arith.constant 0 : i32
    %c0_i32_0 = arith.constant 0 : i32
    %c0_i32_1 = arith.constant 0 : i32
    return %c0_i32, %c0_i32_0 : i32, i32
  }
  func.func @transform_2(%arg0: i32) -> (i32, i32) {
    %c0_i32 = arith.constant 0 : i32
    %c0_i32_0 = arith.constant 0 : i32
    %c0_i32_1 = arith.constant 0 : i32
    return %c0_i32, %c0_i32_0 : i32, i32
  }
  func.func @transform_3(%arg0: i32) -> (i32, i32) {
    %c0_i32 = arith.constant 0 : i32
    %c0_i32_0 = arith.constant 0 : i32
    %c0_i32_1 = arith.constant 0 : i32
    return %c0_i32, %c0_i32_0 : i32, i32
  }
  func.func @transform_4(%arg0: i32) -> (i32, i32) {
    %c0_i32 = arith.constant 0 : i32
    %c0_i32_0 = arith.constant 0 : i32
    %c0_i32_1 = arith.constant 0 : i32
    return %c0_i32, %c0_i32_0 : i32, i32
  }
  func.func @transform_5(%arg0: i32) -> (i32, i32, i32) {
    %c0_i32 = arith.constant 0 : i32
    %c0_i32_0 = arith.constant 0 : i32
    %c0_i32_1 = arith.constant 0 : i32
    return %arg0, %c0_i32, %c0_i32_0 : i32, i32, i32
  }
}

</mosaic_0001>

<bundles_post_ra>
// kernel: tpu_custom_call.1
= control target key start
LH: loop header
LB: loop body
LE: loop exit
PB: predicated region body
PF: predicated region fallthrough
CT: control target
= control target key end

     0   :  { %10 = vsyncpa [#allocation4], 0  ;;  %s2571_s0 = inlined_call_operand.vmem [shape: f32[2,32,256], index: 0, kind: input, shape index: {}]   ;;  %s2572_s1 = inlined_call_operand.vmem [shape: bf16[96,32], index: 1, kind: input, shape index: {}]   ;;  %s2573_s2 = inlined_call_operand.vmem [shape: f32[96,1], index: 2, kind: input, shape index: {}]   ;;  %s2574_s3 = inlined_call_operand.vmem [shape: bf16[32,32], index: 3, kind: input, shape index: {}]   ;;  %s2575_s4 = inlined_call_operand.vmem [shape: f32[32,1], index: 4, kind: input, shape index: {}]   ;;  %s2576_s5 = inlined_call_operand.hbm [shape: f32[2,32,256], index: 5, kind: output, shape index: {}]  }
   0x1   :  { %12 = vsyncpa [#allocation4 + $0x1], 0  ;;  %s1823_s18 = smov 0   ;;  %s1825_s19 = smov 0  }
   0x2   :  { %s1827_s20 = smov 0   ;;  %s1829_s21 = smov 0  }
   0x3 LB: > { %s1844_s22 = sadd.s32 4294967295, %s1788_s21   ;;  %s1405_s23 = sadd.s32 4294967294, %s1788_s21   ;;  %s1788_s21 = sphi %s1829_s21, %s2585_s21   ;;  %s1784_s20 = sphi %s1827_s20, %s2584_s20   ;;  %s1780_s19 = sphi %s1825_s19, %s2583_s19   ;;  %s1776_s18 = sphi %s1823_s18, %s2582_s18  }
   0x4   : > { %s1848_s24 = sadd.s32 1, %s1788_s21   ;;  %s135_s25 = sadd.s32 1, %s1784_s20 }
   0x5   : > { %s132_s26 = ssub.s32 %s1788_s21, %s1848_s24  ;;  %p145_p0 = scmp.ne.s32.totalorder %s1784_s20, %s1780_s19 }
   0x6   : > { %p133_p1 = scmp.eq.s32.totalorder %s132_s26, 0  ;;  %p146_p2 = scmp.eq.s32.totalorder %s1844_s22, 1 }
   0x7   : > { %p151_p3 = scmp.ne.s32.totalorder %s1780_s19, %s1776_s18  ;;  %p152_p4 = scmp.eq.s32.totalorder %s1405_s23, 1 }
   0x8   : > { %s1859_s27 = scalar_select %p133_p1, %s1784_s20, %s135_s25  }
   0x9   : > { %p1861_p5 = por %p146_p2, %p145_p0  ;;  %p1865_p6 = por %p152_p4, %p151_p3 }
   0xa   : > { %p1408_p7 = scmp.ge.s32.totalorder %s1788_s21, 1  ;;  %p190_p8 = scmp.lt.s32.totalorder %s1788_s21, 3 }
   0xc   : > { %p191_p9 = pnand %p1408_p7, %p190_p8 }
   0xe   : > { %194 = sbr.rel (%p191_p9) target bundleno = 1648 (0x670), region = 40 }
  0x13   : > { %p218_p10 = scmp.lt.s32.totalorder %s1844_s22, 1  ;;  %v252_v0 = vld [vmem:[%s2573_s2 + $0x20] sm:$0xff]  ;;  %v1790_v1 = vmov 0   ;;  %v1515_v8 = vld [vmem:[%s2572_s1 + $0x8] sm:$0xff]  ;;  %vm350_vm0 = vcmask 261120   ;;  %v250_v10 = vld [vmem:[%s2573_s2 + $0x10] sm:$0xff] }
  0x14   : > { %1583 = vset.pattern.permute.xlu0 %v1790_v1  ;;  %1585 = vset.pattern.permute.xlu2 %v1790_v1  ;;  %v253_v9 = vld [vmem:[%s2573_s2 + $0x28] sm:$0xff]  ;;  %v254_v11 = vld [vmem:[%s2573_s2 + $0x30] sm:$0xff]  ;;  %v251_v12 = vld [vmem:[%s2573_s2 + $0x18] sm:$0xff]  ;;  %s215_s13 = sand.u32 1, %s1780_s19   ;;  %s1526_s16 = sshll.u32 %s1844_s22, 6 }
  0x15   : > { %s219_s7 = scalar_select %p218_p10, %s1844_s22, 1  ;;  %282 = vperm.xlu0 %1583, %v252_v0   ;;  %1584 = vset.pattern.permute.xlu1 %v1790_v1  ;;  %v1516_v13 = vld [vmem:[%s2572_s1 + $0x10] sm:$0xff]  ;;  %v255_v14 = vld [vmem:[%s2573_s2 + $0x38] sm:$0xff]  ;;  %v248_v15 = vld [vmem:[%s2573_s2] sm:$0xff] }
  0x16   : > { %272 = vperm.xlu2 %1585, %v250_v10   ;;  %292 = vperm.xlu1 %1584, %v254_v11   ;;  %v249_v16 = vld [vmem:[%s2573_s2 + $0x8] sm:$0xff]  ;;  %v256_v17 = vld [vmem:[%s2573_s2 + $0x40] sm:$0xff]  ;;  %v1517_v18 = vld [vmem:[%s2572_s1 + $0x18] sm:$0xff]  ;;  %s1409_s14 = sshll.u32 %s215_s13, 6  ;;  %s1339_s25 = scalar_lea.hbm %s2576_s5, %s1526_s16 }
  0x17   : > { %s1513_s8 = sshll.u32 %s219_s7, 6  ;;  %v257_v19 = vld [vmem:[%s2573_s2 + $0x48] sm:$0xff]  ;;  %v258_v23 = vld [vmem:[%s2573_s2 + $0x50] sm:$0xff]  ;;  %v1514_v26 = vld [vmem:[%s2572_s1] sm:$0xff]  ;;  %s2516_s15 = scalar_lea.vmem [#allocation3], %s1409_s14 }
  0x18   : > { %s1879_s11 = scalar_lea.vmem %s2571_s0, %s1513_s8  ;;  %v1518_v28 = vld [vmem:[%s2572_s1 + $0x20] sm:$0xff]  ;;  %v259_v29 = vld [vmem:[%s2573_s2 + $0x58] sm:$0xff]  ;;  %v1519_v30 = vld [vmem:[%s2572_s1 + $0x28] sm:$0xff]  ;;  %s1340_s26 = sshll.u32 %s2516_s15, 4  ;;  %s1341_s26 = int_to_ptr.vmem [resolvable:$true] %s1340_s26 }
  0x19   : > { %v228_v2 = vld [vmem:[%s1879_s11 + $0x20] sm:$0xff]  ;;  %v230_v3 = vld [vmem:[%s1879_s11 + $0x30] sm:$0xff]  ;;  %v229_v20 = vld [vmem:[%s1879_s11 + $0x28] sm:$0xff]  ;;  %s1342_s30 = sshll.u32 %s1339_s25, 4  ;;  %s1328_s6 = scalar_lea.sflag [#allocation4], %s215_s13  ;;  %s1343_s30 = int_to_ptr.hbm [resolvable:$true] %s1342_s30 }
  0x1a   : > { %v224_v4 = vld [vmem:[%s1879_s11] sm:$0xff]  ;;  %v234_v5 = vpack.c.bf16 %v230_v3, %v228_v2  ;;  %v226_v6 = vld [vmem:[%s1879_s11 + $0x10] sm:$0xff]  ;;  %v231_v21 = vld [vmem:[%s1879_s11 + $0x38] sm:$0xff]  ;;  %s1740_s22 = sshra.s32 %s1343_s30, 4  ;;  %s1746_s10 = scalar_lea.hbm %s2576_s5, 128  ;;  %s1741_s22 = int_to_ptr.hbm [resolvable:$true] %s1740_s22 }
  0x1b   : > { %v232_v7 = vpack.c.bf16 %v226_v6, %v224_v4  ;;  %v235_v22 = vpack.c.bf16 %v231_v21, %v229_v20  ;;  %v225_v24 = vld [vmem:[%s1879_s11 + $0x8] sm:$0xff]  ;;  %v227_v25 = vld [vmem:[%s1879_s11 + $0x18] sm:$0xff]  ;;  %v1213_v31 = vld [vmem:[%s2575_s4] sm:$0xff]  ;;  %s1742_s7 = scalar_lea.hbm %s1741_s22, 64  ;;  %p1747_p0 = scmp.lt.s32.totalorder %s1741_s22, %s2576_s5 }
  0x1c   : > { %1527 = vmatpush.bf16.msra.mxu1 %v234_v5  ;;  %375 = vmatpush.bf16.msra.mxu0 %v234_v5  ;;  %v233_v27 = vpack.c.bf16 %v227_v25, %v225_v24  ;;  %v1215_v32 = vld [vmem:[%s2575_s4 + $0x10] sm:$0xff]  ;;  %v1214_v33 = vld [vmem:[%s2575_s4 + $0x8] sm:$0xff]  ;;  %v1216_v34 = vld [vmem:[%s2575_s4 + $0x18] sm:$0xff]  ;;  %p1743_p11 = scmp.ne.s32.totalorder %s1741_s22, %s1742_s7  ;;  %p1748_p1 = scmp.lt.s32.totalorder %s1746_s10, %s1742_s7 }
  0x1d   : > { %287 = vperm.xlu0 %1583, %v253_v9  }
  0x1e   : > { %277 = vperm.xlu2 %1585, %v251_v12   ;;  %297 = vperm.xlu1 %1584, %v255_v14   ;;  %p1744_p12 = pnand %p1743_p11, %p1861_p5  ;;  %p1749_p2 = por %p1748_p1, %p1747_p0 }
  0x20   : > { %1528 = vmatpush.bf16.msra.mxu1 %v232_v7  ;;  %376 = vmatpush.bf16.msra.mxu0 %v232_v7  ;;  %p1745_p13 = pneg %p1744_p12 }
  0x22   : > { %p1750_p3 = pnand %p1749_p2, %p1745_p13 }
  0x23   : > { %1437 = vmatmul.msk.bf16.vlgmr.msra.gmra.mxu1 %vm350_vm0, %v1515_v8  ;;  %1436 = vmatmul.msk.bf16.vlgmr.msra.gmra.mxu0 %vm350_vm0, %v1514_v26 }
  0x24   : > { %414 = vmatpush.bf16.msrb.mxu1 %v235_v22 }
  0x25   : > { %262 = vperm.xlu0 %1583, %v248_v15  }
  0x26   : > { %267 = vperm.xlu1 %1584, %v249_v16  }
  0x28   : > { %415 = vmatpush.bf16.msrb.mxu1 %v233_v27 }
  0x2d   : > { %302 = vperm.xlu0 %1583, %v256_v17  }
  0x2e   : > { %307 = vperm.xlu1 %1584, %v257_v19  }
  0x33   : > { %1438 = vmatmul.msk.bf16.gmra.mxu1 %vm350_vm0, %v1516_v13 }
  0x35   : > { %312 = vperm.xlu0 %1583, %v258_v23  }
  0x36   : > { %317 = vperm.xlu1 %1584, %v259_v29  }
  0x3d   : > { %1219 = vperm.xlu0 %1583, %v1213_v31  }
  0x3e   : > { %1224 = vperm.xlu1 %1584, %v1214_v33  }
  0x43   : > { %1439 = vmatmul.msk.bf16.gmra.mxu1 %vm350_vm0, %v1517_v18 }
  0x45   : > { %1229 = vperm.xlu0 %1583, %v1215_v32  }
  0x46   : > { %1234 = vperm.xlu1 %1584, %v1216_v34  }
  0x53   : > { %1440 = vmatmul.msk.bf16.gmra.mxu1 %vm350_vm0, %v1518_v28 }
  0x63   : > { %1441 = vmatmul.msk.bf16.gmra.mxu1 %vm350_vm0, %v1519_v30 }
  0x70   : > { %v273_v50 = vpop.permute.xlu2 %272 }
  0x73   : > { %1442 = vmatmul.msk.bf16.vlgmr.msrb.gmra.mxu1 %vm350_vm0, %v1514_v26 }
  0x78   : > { %v278_v55 = vpop.permute.xlu2 %277 }
  0x83   : > { %1443 = vmatmul.msk.bf16.gmra.mxu1 %vm350_vm0, %v1515_v8 }
  0x87   : > { %v283_v47 = vpop.permute.xlu0 %282 }
  0x88   : > { %v293_v46 = vpop.permute.xlu1 %292 }
  0x8f   : > { %v288_v52 = vpop.permute.xlu0 %287 }
  0x90   : > { %v298_v51 = vpop.permute.xlu1 %297 }
  0x93   : > { %1444 = vmatmul.msk.bf16.gmra.mxu1 %vm350_vm0, %v1516_v13 }
  0x97   : > { %v263_v62 = vpop.permute.xlu0 %262 }
  0x98   : > { %v268_v57 = vpop.permute.xlu1 %267 }
  0xa0   : > { %v383_v35 = vpop.f32.mrf.mxu1  ;;  %v378_v49 = vpop.f32.mrf.mxu0 }
  0xa1   : > { %v384_v58 = vadd.f32 %v383_v35, %v273_v50  ;;  %v379_v0 = vadd.f32 %v378_v49, %v263_v62 }
  0xa3   : > { %1445 = vmatmul.msk.bf16.gmra.mxu1 %vm350_vm0, %v1517_v18 }
  0xa8   : > { %v385_v36 = vpop.f32.mrf.mxu1  ;;  %v380_v54 = vpop.f32.mrf.mxu0 }
  0xa9   : > { %v381_v59 = vadd.f32 %v380_v54, %v268_v57  ;;  %v386_v61 = vadd.f32 %v385_v36, %v278_v55 }
  0xb0   : > { %v388_v37 = vpop.f32.mrf.mxu1 }
  0xb1   : > { %v389_v20 = vadd.f32 %v388_v37, %v283_v47 }
  0xb3   : > { %1446 = vmatmul.msk.bf16.gmra.mxu1 %vm350_vm0, %v1518_v28 }
  0xb8   : > { %v390_v38 = vpop.f32.mrf.mxu1 }
  0xb9   : > { %v391_v23 = vadd.f32 %v390_v38, %v288_v52 }
  0xc0   : > { %v1963_v39 = vpop.f32.mrf.mxu1 }
  0xc1   : > { %v394_v35 = vadd.f32 %v1963_v39, %v293_v46 }
  0xc3   : > { %1447 = vmatmul.msk.bf16.gmra.mxu1 %vm350_vm0, %v1519_v30 }
  0xc8   : > { %v1966_v40 = vpop.f32.mrf.mxu1 }
  0xc9   : > { %v396_v37 = vadd.f32 %v1966_v40, %v298_v51 }
  0xd0   : > { %v1968_v41 = vpop.f32.mrf.mxu1 }
  0xd8   : > { %v1970_v42 = vpop.f32.mrf.mxu1 }
  0xe0   : > { %v1972_v43 = vpop.f32.mrf.mxu1 }
  0xe8   : > { %v1974_v44 = vpop.f32.mrf.mxu1 }
  0xf0   : > { %v417_v45 = vpop.f32.mrf.mxu1 }
  0xf1   : > { %v418_v1 = vadd.f32 %v417_v45, %v263_v62 }
  0xf3   : > { %v447_v6 = vpack.c.bf16 %v418_v1, %v379_v0 }
  0xf5   : > { %v507_v13 = vunpack.c.l.b16 %v447_v6  ;;  %v890_v19 = vunpack.c.h.b16 %v447_v6 }
  0xf8   : > { %v419_v48 = vpop.f32.mrf.mxu1 }
  0xf9   : > { %v420_v60 = vadd.f32 %v419_v48, %v268_v57 }
  0xfb   : > { %v448_v4 = vpack.c.bf16 %v420_v60, %v381_v59 }
  0xfd   : > { %v508_v10 = vunpack.c.l.b16 %v448_v4  ;;  %v891_v16 = vunpack.c.h.b16 %v448_v4 }
  0xff   : > { %v511_v15 = vpack.c.b16 %v508_v10, %v507_v13  ;;  %v1979_v22 = vpack.c.b16 %v891_v16, %v890_v19 }
 0x100   : > { %v422_v53 = vpop.f32.mrf.mxu1 }
 0x101   : > { %v423_v56 = vadd.f32 %v422_v53, %v273_v50 }
 0x103   : > { %v449_v2 = vpack.c.bf16 %v423_v56, %v384_v58  ;;  %v308_v56 = vpop.permute.xlu1 %307  ;;  %v303_v58 = vpop.permute.xlu0 %302 }
 0x104   : > { %v401_v39 = vadd.f32 %v1970_v42, %v308_v56  ;;  %v399_v40 = vadd.f32 %v1968_v41, %v303_v58 }
 0x105   : > { %v509_v7 = vunpack.c.l.b16 %v449_v2  ;;  %v892_v14 = vunpack.c.h.b16 %v449_v2 }
 0x108   : > { %v424_v63 = vpop.f32.mrf.mxu1 }
 0x109   : > { %v425_v3 = vadd.f32 %v424_v63, %v278_v55 }
 0x10b   : > { %v450_v5 = vpack.c.bf16 %v425_v3, %v386_v61  ;;  %v318_v6 = vpop.permute.xlu1 %317 }
 0x10c   : > { %v406_v41 = vadd.f32 %v1974_v44, %v318_v6 }
 0x10d   : > { %v510_v8 = vunpack.c.l.b16 %v450_v5  ;;  %v893_v11 = vunpack.c.h.b16 %v450_v5  ;;  %v313_v5 = vpop.permute.xlu0 %312 }
 0x10e   : > { %v404_v42 = vadd.f32 %v1972_v43, %v313_v5 }
 0x10f   : > { %v512_v9 = vpack.c.b16 %v510_v8, %v509_v7  ;;  %v1976_v17 = vpack.c.b16 %v893_v11, %v892_v14 }
 0x110   : > { %v427_v12 = vpop.f32.mrf.mxu1 }
 0x111   : > { %569 = vmatpush.bf16.msrb.mxu0 %v512_v9  ;;  %1529 = vmatpush.bf16.msra.mxu2 %v512_v9  ;;  %v428_v18 = vadd.f32 %v427_v12, %v283_v47 }
 0x113   : > { %v451_v24 = vpack.c.bf16 %v428_v18, %v389_v20 }
 0x115   : > { %570 = vmatpush.bf16.msrb.mxu0 %v511_v15  ;;  %1530 = vmatpush.bf16.msra.mxu2 %v511_v15  ;;  %v463_v27 = vunpack.c.l.b16 %v451_v24  ;;  %v464_v28 = vunpack.c.h.b16 %v451_v24 }
 0x118   : > { %v429_v21 = vpop.f32.mrf.mxu1 }
 0x119   : > { %904 = vmatpush.bf16.msra.mxu0 %v1976_v17  ;;  %v430_v25 = vadd.f32 %v429_v21, %v288_v52 }
 0x11b   : > { %v452_v26 = vpack.c.bf16 %v430_v25, %v391_v23 }
 0x11d   : > { %905 = vmatpush.bf16.msra.mxu0 %v1979_v22  ;;  %v465_v29 = vunpack.c.l.b16 %v452_v26  ;;  %v466_v30 = vunpack.c.h.b16 %v452_v26 }
 0x11f   : > { %v471_v31 = vpack.c.b16 %v465_v29, %v463_v27  ;;  %v472_v32 = vpack.c.b16 %v466_v30, %v464_v28 }
 0x120   : > { %v432_v33 = vpop.f32.mrf.mxu1 }
 0x121   : > { %479 = vxpose.binary.xlu2.c.b16.start [1/4] (short) %v472_v32, %v471_v31, 128  ;;  %v433_v34 = vadd.f32 %v432_v33, %v293_v46 }
 0x123   : > { %v453_v38 = vpack.c.bf16 %v433_v34, %v394_v35 }
 0x125   : > { %v467_v48 = vunpack.c.l.b16 %v453_v38  ;;  %v468_v49 = vunpack.c.h.b16 %v453_v38 }
 0x128   : > { %v434_v36 = vpop.f32.mrf.mxu1 }
 0x129   : > { %v435_v45 = vadd.f32 %v434_v36, %v298_v51 }
 0x12b   : > { %v454_v47 = vpack.c.bf16 %v435_v45, %v396_v37 }
 0x12d   : > { %v469_v50 = vunpack.c.l.b16 %v454_v47  ;;  %v470_v52 = vunpack.c.h.b16 %v454_v47 }
 0x12f   : > { %v473_v53 = vpack.c.b16 %v469_v50, %v467_v48  ;;  %v474_v54 = vpack.c.b16 %v470_v52, %v468_v49 }
 0x130   : > { %v437_v55 = vpop.f32.mrf.mxu1 }
 0x131   : > { %480 = vxpose.binary.xlu2.c.b16.end [2/4] (short) %v474_v54, %v473_v53, 128  ;;  %v438_v46 = vadd.f32 %v437_v55, %v303_v58 }
 0x133   : > { %v455_v51 = vpack.c.bf16 %v438_v46, %v399_v40 }
 0x135   : > { %v811_v63 = vunpack.c.h.b16 %v455_v51  ;;  %v810_v0 = vunpack.c.l.b16 %v455_v51 }
 0x138   : > { %v439_v57 = vpop.f32.mrf.mxu1 }
 0x139   : > { %v440_v59 = vadd.f32 %v439_v57, %v308_v56 }
 0x13b   : > { %v456_v60 = vpack.c.bf16 %v440_v59, %v401_v39 }
 0x13d   : > { %v813_v61 = vunpack.c.h.b16 %v456_v60  ;;  %v812_v1 = vunpack.c.l.b16 %v456_v60 }
 0x13f   : > { %v1986_v2 = vpack.c.b16 %v812_v1, %v810_v0  ;;  %v1988_v3 = vpack.c.b16 %v813_v61, %v811_v63 }
 0x140   : > { %v442_v62 = vpop.f32.mrf.mxu1 }
 0x141   : > { %v443_v7 = vadd.f32 %v442_v62, %v313_v5 }
 0x143   : > { %v457_v9 = vpack.c.bf16 %v443_v7, %v404_v42 }
 0x145   : > { %v814_v11 = vunpack.c.l.b16 %v457_v9  ;;  %v815_v13 = vunpack.c.h.b16 %v457_v9 }
 0x148   : > { %v444_v4 = vpop.f32.mrf.mxu1 }
 0x149   : > { %v445_v8 = vadd.f32 %v444_v4, %v318_v6 }
 0x14b   : > { %v458_v10 = vpack.c.bf16 %v445_v8, %v406_v41 }
 0x14d   : > { %v816_v12 = vunpack.c.l.b16 %v458_v10  ;;  %v817_v14 = vunpack.c.h.b16 %v458_v10 }
 0x14f   : > { %v1992_v15 = vpack.c.b16 %v816_v12, %v814_v11  ;;  %v1994_v16 = vpack.c.b16 %v817_v14, %v815_v13 }
 0x1c2   : > { %v487_v18 = vpop.trf.xlu2 }
 0x1c3   : > { %1448 = vmatmul.msk.bf16.vlgmr.msrb.gmra.mxu0 %vm350_vm0, %v487_v18 }
 0x1ca   : > { %v1997_v19 = vpop.trf.xlu2 }
 0x1d2   : > { %v489_v20 = vpop.trf.xlu2 }
 0x1d3   : > { %1449 = vmatmul.msk.bf16.vlgmr.msra.gmra.mxu2 %vm350_vm0, %v489_v20  ;;  %1464 = vmatmul.msk.bf16.vlgmr.msra.gmra.mxu0 %vm350_vm0, %v487_v18 }
 0x1da   : > { %v2001_v43 = vpop.trf.xlu2 }
 0x1e2   : > { %v491_v44 = vpop.trf.xlu2 }
 0x1e3   : > { %1450 = vmatmul.msk.bf16.gmra.mxu2 %vm350_vm0, %v491_v44  ;;  %1465 = vmatmul.msk.bf16.gmra.mxu0 %vm350_vm0, %v489_v20 }
 0x1ea   : > { %v2005_v21 = vpop.trf.xlu2 }
 0x1f2   : > { %v493_v23 = vpop.trf.xlu2 }
 0x1f3   : > { %1451 = vmatmul.msk.bf16.gmra.mxu2 %vm350_vm0, %v493_v23  ;;  %1466 = vmatmul.msk.bf16.gmra.mxu0 %vm350_vm0, %v491_v44 }
 0x1fa   : > { %v2009_v24 = vpop.trf.xlu2 }
 0x202   : > { %v495_v25 = vpop.trf.xlu2 }
 0x203   : > { %1452 = vmatmul.msk.bf16.gmra.mxu2 %vm350_vm0, %v495_v25  ;;  %1467 = vmatmul.msk.bf16.gmra.mxu0 %vm350_vm0, %v493_v23 }
 0x20a   : > { %v2013_v26 = vpop.trf.xlu2 }
 0x212   : > { %v497_v27 = vpop.trf.xlu2 }
 0x213   : > { %1453 = vmatmul.msk.bf16.gmra.mxu2 %vm350_vm0, %v497_v27  ;;  %1468 = vmatmul.msk.bf16.gmra.mxu0 %vm350_vm0, %v495_v25 }
 0x21a   : > { %v2017_v28 = vpop.trf.xlu2 }
 0x222   : > { %v499_v29 = vpop.trf.xlu2 }
 0x223   : > { %1454 = vmatmul.msk.bf16.gmra.mxu2 %vm350_vm0, %v499_v29  ;;  %1469 = vmatmul.msk.bf16.gmra.mxu0 %vm350_vm0, %v497_v27 }
 0x22a   : > { %v2021_v30 = vpop.trf.xlu2 }
 0x232   : > { %v2023_v31 = vpop.trf.xlu2 }
 0x233   : > { %1455 = vmatmul.msk.bf16.gmra.mxu2 %vm350_vm0, %v2023_v31  ;;  %1470 = vmatmul.msk.bf16.gmra.mxu0 %vm350_vm0, %v499_v29 }
 0x23a   : > { %v2066_v52 = vpop.trf.xlu2 }
 0x23b   : > { %2580 = vst [vmem:[#allocation6_spill] sm:$0xff] %v2066_v52 }
 0x240   : > { %v572_v63 = vpop.f32.mrf.mxu0 }
 0x243   : > { %1456 = vmatmul.msk.bf16.gmra.mxu2 %vm350_vm0, %v1997_v19 }
 0x248   : > { %v574_v4 = vpop.f32.mrf.mxu0 }
 0x253   : > { %1457 = vmatmul.msk.bf16.gmra.mxu2 %vm350_vm0, %v2001_v43 }
 0x256   : > { %v2032_v32 = vpop.f32.mrf.mxu2 }
 0x25e   : > { %v2034_v33 = vpop.f32.mrf.mxu2 }
 0x263   : > { %1458 = vmatmul.msk.bf16.gmra.mxu2 %vm350_vm0, %v2005_v21 }
 0x266   : > { %v2038_v34 = vpop.f32.mrf.mxu2 }
 0x267   : > { %v652_v6 = vmax.f32 %v572_v63, %v2038_v34 }
 0x26e   : > { %v2040_v35 = vpop.f32.mrf.mxu2 }
 0x26f   : > { %v653_v5 = vmax.f32 %v574_v4, %v2040_v35 }
 0x273   : > { %1459 = vmatmul.msk.bf16.gmra.mxu2 %vm350_vm0, %v2009_v24 }
 0x276   : > { %v2044_v36 = vpop.f32.mrf.mxu2 }
 0x277   : > { %v654_v7 = vmax.f32 %v2032_v32, %v2044_v36 }
 0x27e   : > { %v2046_v37 = vpop.f32.mrf.mxu2 }
 0x27f   : > { %v655_v8 = vmax.f32 %v2034_v33, %v2046_v37 }
 0x283   : > { %1460 = vmatmul.msk.bf16.gmra.mxu2 %vm350_vm0, %v2013_v26 }
 0x286   : > { %v2050_v38 = vpop.f32.mrf.mxu2 }
 0x287   : > { %v656_v41 = vmax.f32 %v652_v6, %v2050_v38 }
 0x28e   : > { %v2052_v45 = vpop.f32.mrf.mxu2 }
 0x28f   : > { %v657_v42 = vmax.f32 %v653_v5, %v2052_v45 }
 0x293   : > { %1461 = vmatmul.msk.bf16.gmra.mxu2 %vm350_vm0, %v2017_v28 }
 0x296   : > { %v2056_v47 = vpop.f32.mrf.mxu2 }
 0x297   : > { %v658_v9 = vmax.f32 %v654_v7, %v2056_v47 }
 0x29e   : > { %v2058_v48 = vpop.f32.mrf.mxu2 }
 0x29f   : > { %v659_v10 = vmax.f32 %v655_v8, %v2058_v48 }
 0x2a3   : > { %1462 = vmatmul.msk.bf16.gmra.mxu2 %vm350_vm0, %v2021_v30 }
 0x2a6   : > { %v2062_v49 = vpop.f32.mrf.mxu2 }
 0x2a7   : > { %v660_v13 = vmax.f32 %v656_v41, %v2062_v49 }
 0x2ae   : > { %v2064_v50 = vpop.f32.mrf.mxu2 }
 0x2af   : > { %v661_v11 = vmax.f32 %v657_v42, %v2064_v50 }
 0x2b3   : > { %1463 = vmatmul.msk.bf16.gmra.mxu2 %vm350_vm0, %v2066_v52 }
 0x2b6   : > { %v2070_v53 = vpop.f32.mrf.mxu2 }
 0x2b7   : > { %v662_v14 = vmax.f32 %v658_v9, %v2070_v53 }
 0x2be   : > { %v2072_v54 = vpop.f32.mrf.mxu2 }
 0x2bf   : > { %v663_v18 = vmax.f32 %v659_v10, %v2072_v54 }
 0x2c6   : > { %v2074_v55 = vpop.f32.mrf.mxu2 }
 0x2c7   : > { %v664_v44 = vmax.f32 %v660_v13, %v2074_v55 }
 0x2ce   : > { %v2076_v56 = vpop.f32.mrf.mxu2 }
 0x2cf   : > { %v665_v20 = vmax.f32 %v661_v11, %v2076_v56 }
 0x2d6   : > { %v2078_v57 = vpop.f32.mrf.mxu2 }
 0x2d7   : > { %v666_v23 = vmax.f32 %v662_v14, %v2078_v57 }
 0x2de   : > { %v2080_v58 = vpop.f32.mrf.mxu2 }
 0x2df   : > { %v667_v25 = vmax.f32 %v663_v18, %v2080_v58 }
 0x2e6   : > { %v2082_v59 = vpop.f32.mrf.mxu2 }
 0x2e7   : > { %v668_v29 = vmax.f32 %v664_v44, %v2082_v59 }
 0x2ee   : > { %v2084_v39 = vpop.f32.mrf.mxu2 }
 0x2ef   : > { %v669_v27 = vmax.f32 %v665_v20, %v2084_v39 }
 0x2f6   : > { %v2086_v46 = vpop.f32.mrf.mxu2 }
 0x2f7   : > { %v670_v5 = vmax.f32 %v666_v23, %v2086_v46 }
 0x2fe   : > { %v2088_v40 = vpop.f32.mrf.mxu2 }
 0x2ff   : > { %v671_v6 = vmax.f32 %v667_v25, %v2088_v40 }
 0x306   : > { %v2090_v60 = vpop.f32.mrf.mxu2 }
 0x307   : > { %v672_v8 = vmax.f32 %v668_v29, %v2090_v60 }
 0x30e   : > { %v2092_v51 = vpop.f32.mrf.mxu2 }
 0x30f   : > { %v673_v7 = vmax.f32 %v669_v27, %v2092_v51 }
 0x316   : > { %v2094_v61 = vpop.f32.mrf.mxu2 }
 0x317   : > { %v674_v42 = vmax.f32 %v670_v5, %v2094_v61 }
 0x31e   : > { %v2096_v62 = vpop.f32.mrf.mxu2 }
 0x31f   : > { %v675_v41 = vmax.f32 %v671_v6, %v2096_v62 }
 0x326   : > { %v2098_v0 = vpop.f32.mrf.mxu2 }
 0x327   : > { %v676_v11 = vmax.f32 %v672_v8, %v2098_v0 }
 0x32e   : > { %v2100_v1 = vpop.f32.mrf.mxu2 }
 0x32f   : > { %v677_v9 = vmax.f32 %v673_v7, %v2100_v1 }
 0x331   : > { %v680_v18 = vmax.f32 %v676_v11, %v677_v9 }
 0x336   : > { %v2113_v12 = vpop.f32.mrf.mxu2 }
 0x337   : > { %v678_v13 = vmax.f32 %v674_v42, %v2113_v12 }
 0x33e   : > { %v2131_v10 = vpop.f32.mrf.mxu2 }
 0x33f   : > { %v679_v14 = vmax.f32 %v675_v41, %v2131_v10 }
 0x341   : > { %v681_v20 = vmax.f32 %v678_v13, %v679_v14 }
 0x343   : > { %v682_v44 = vmax.f32 %v680_v18, %v681_v20 }
 0x345   : > { %v683_v23 = vrot.slane %v682_v44, 4 }
 0x347   : > { %v684_v25 = vmax.f32 %v682_v44, %v683_v23 }
 0x349   : > { %v685_v27 = vrot.slane %v684_v25, 2 }
 0x34b   : > { %v686_v29 = vmax.f32 %v684_v25, %v685_v27 }
 0x34d   : > { %v687_v5 = vrot.slane %v686_v29, 1 }
 0x34f   : > { %v2136_v52 = vmax.f32 %v686_v29, %v687_v5 }
 0x351   : > { %v689_v6 = vsub.f32 %v572_v63, %v2136_v52  ;;  %v690_v7 = vsub.f32 %v574_v4, %v2136_v52  ;;  %v691_v8 = vsub.f32 %v2032_v32, %v2136_v52  ;;  %v692_v42 = vsub.f32 %v2034_v33, %v2136_v52 }
 0x352   : > { %v693_v41 = vsub.f32 %v2038_v34, %v2136_v52  ;;  %v694_v9 = vsub.f32 %v2040_v35, %v2136_v52  ;;  %v695_v63 = vsub.f32 %v2044_v36, %v2136_v52  ;;  %v696_v32 = vsub.f32 %v2046_v37, %v2136_v52 }
 0x353   : > { %1586 = vpow2.f32 %v689_v6  ;;  %v697_v33 = vsub.f32 %v2050_v38, %v2136_v52  ;;  %v698_v35 = vsub.f32 %v2052_v45, %v2136_v52  ;;  %v703_v36 = vsub.f32 %v2070_v53, %v2136_v52 }
 0x354   : > { %1588 = vpow2.f32 %v690_v7  ;;  %v704_v38 = vsub.f32 %v2072_v54, %v2136_v52  ;;  %v701_v18 = vsub.f32 %v2062_v49, %v2136_v52  ;;  %v702_v53 = vsub.f32 %v2064_v50, %v2136_v52 }
 0x355   : > { %1590 = vpow2.f32 %v691_v8  ;;  %v699_v54 = vsub.f32 %v2056_v47, %v2136_v52  ;;  %v700_v50 = vsub.f32 %v2058_v48, %v2136_v52  ;;  %v716_v48 = vsub.f32 %v2096_v62, %v2136_v52 }
 0x356   : > { %1592 = vpow2.f32 %v692_v42  ;;  %v706_v62 = vsub.f32 %v2076_v56, %v2136_v52 }
 0x357   : > { %1594 = vpow2.f32 %v693_v41  ;;  %v715_v41 = vsub.f32 %v2094_v61, %v2136_v52  ;;  %v705_v61 = vsub.f32 %v2074_v55, %v2136_v52  ;;  %v708_v55 = vsub.f32 %v2080_v58, %v2136_v52 }
 0x358   : > { %1596 = vpow2.f32 %v694_v9 }
 0x359   : > { %v2148_v11 = vpop.eup %1586  ;;  %1598 = vpow2.f32 %v695_v63 }
 0x35a   : > { %v2152_v4 = vpop.eup %1588  ;;  %1600 = vpow2.f32 %v696_v32 }
 0x35b   : > { %v753_v34 = vadd.f32 %v2152_v4, %v2148_v11  ;;  %v2160_v13 = vpop.eup %1590  ;;  %1602 = vpow2.f32 %v697_v33  ;;  %v717_v33 = vsub.f32 %v2098_v0, %v2136_v52 }
 0x35c   : > { %v2167_v37 = vpop.eup %1592  ;;  %1604 = vpow2.f32 %v698_v35 }
 0x35d   : > { %v754_v14 = vadd.f32 %v2160_v13, %v753_v34  ;;  %v2174_v45 = vpop.eup %1594  ;;  %1606 = vpow2.f32 %v703_v36  ;;  %v718_v36 = vsub.f32 %v2100_v1, %v2136_v52  ;;  %v707_v1 = vsub.f32 %v2078_v57, %v2136_v52 }
 0x35e   : > { %v2179_v23 = vpop.eup %1596  ;;  %1608 = vpow2.f32 %v704_v38  ;;  %v709_v57 = vsub.f32 %v2082_v59, %v2136_v52 }
 0x35f   : > { %v755_v20 = vadd.f32 %v2167_v37, %v754_v14  ;;  %v2183_v25 = vpop.eup %1598  ;;  %1610 = vpow2.f32 %v701_v18 }
 0x360   : > { %v2186_v27 = vpop.eup %1600  ;;  %1612 = vpow2.f32 %v702_v53 }
 0x361   : > { %v756_v44 = vadd.f32 %v2174_v45, %v755_v20  ;;  %v1603_v29 = vpop.eup %1602  ;;  %1614 = vpow2.f32 %v699_v54  ;;  %v793_v59 = vpack.c.bf16 %v2186_v27, %v2183_v25 }
 0x362   : > { %v1605_v6 = vpop.eup %1604  ;;  %1616 = vpow2.f32 %v700_v50 }
 0x363   : > { %v757_v49 = vadd.f32 %v2179_v23, %v756_v44  ;;  %v1607_v7 = vpop.eup %1606  ;;  %1618 = vpow2.f32 %v715_v41  ;;  %v710_v41 = vsub.f32 %v2084_v39, %v2136_v52  ;;  %v711_v39 = vsub.f32 %v2086_v46, %v2136_v52 }
 0x364   : > { %v1609_v8 = vpop.eup %1608  ;;  %1620 = vpow2.f32 %v716_v48 }
 0x365   : > { %v758_v5 = vadd.f32 %v2183_v25, %v757_v49  ;;  %v1611_v42 = vpop.eup %1610  ;;  %v797_v63 = vpack.c.bf16 %v1609_v8, %v1607_v7  ;;  %1622 = vpow2.f32 %v717_v33  ;;  %v792_v33 = vpack.c.bf16 %v2179_v23, %v2174_v45 }
 0x366   : > { %v1613_v32 = vpop.eup %1612  ;;  %1624 = vpow2.f32 %v718_v36  ;;  %v713_v25 = vsub.f32 %v2090_v60, %v2136_v52 }
 0x367   : > { %v759_v47 = vadd.f32 %v2186_v27, %v758_v5  ;;  %826 = vmatpush.bf16.msra.mxu3 %v797_v63  ;;  %v1615_v35 = vpop.eup %1614  ;;  %v796_v38 = vpack.c.bf16 %v1613_v32, %v1611_v42  ;;  %1626 = vpow2.f32 %v705_v61  ;;  %v794_v5 = vpack.c.bf16 %v1605_v6, %v1603_v29 }
 0x368   : > { %v1617_v18 = vpop.eup %1616  ;;  %1628 = vpow2.f32 %v706_v62  ;;  %v790_v61 = vpack.c.bf16 %v2152_v4, %v2148_v11 }
 0x369   : > { %v760_v9 = vadd.f32 %v1603_v29, %v759_v47  ;;  %v795_v53 = vpack.c.bf16 %v1617_v18, %v1615_v35  ;;  %v2206_v44 = vpop.eup %1618  ;;  %1630 = vpow2.f32 %v707_v1  ;;  %v719_v29 = vsub.f32 %v2113_v12, %v2136_v52 }
 0x36a   : > { %v2208_v49 = vpop.eup %1620  ;;  %1632 = vpow2.f32 %v708_v55  ;;  %v712_v12 = vsub.f32 %v2088_v40, %v2136_v52 }
 0x36b   : > { %v761_v34 = vadd.f32 %v1605_v6, %v760_v9  ;;  %827 = vmatpush.bf16.msra.mxu3 %v796_v38  ;;  %v2212_v50 = vpop.eup %1622  ;;  %v803_v47 = vpack.c.bf16 %v2208_v49, %v2206_v44  ;;  %v720_v6 = vsub.f32 %v2131_v10, %v2136_v52  ;;  %1634 = vpow2.f32 %v709_v57 }
 0x36c   : > { %1636 = vpow2.f32 %v710_v41 }
 0x36d   : > { %v762_v14 = vadd.f32 %v1615_v35, %v761_v34  ;;  %1638 = vpow2.f32 %v719_v29  ;;  %v714_v35 = vsub.f32 %v2092_v51, %v2136_v52 }
 0x36e   : > { %1640 = vpow2.f32 %v720_v6 }
 0x36f   : > { %v763_v20 = vadd.f32 %v1617_v18, %v762_v14  ;;  %828 = vmatpush.bf16.msra.mxu3 %v795_v53  ;;  %1642 = vpow2.f32 %v711_v39  ;;  %v791_v14 = vpack.c.bf16 %v2167_v37, %v2160_v13 }
 0x370   : > { %1644 = vpow2.f32 %v712_v12 }
 0x371   : > { %v764_v0 = vadd.f32 %v1611_v42, %v763_v20  ;;  %v1625_v42 = vpop.eup %1624  ;;  %1646 = vpow2.f32 %v713_v25 }
 0x372   : > { %v804_v58 = vpack.c.bf16 %v1625_v42, %v2212_v50  ;;  %v2221_v63 = vpop.eup %1626  ;;  %1648 = vpow2.f32 %v714_v35 }
 0x373   : > { %v765_v54 = vadd.f32 %v1613_v32, %v764_v0  ;;  %829 = vmatpush.bf16.msra.mxu3 %v794_v5  ;;  %v1629_v32 = vpop.eup %1628 }
 0x374   : > { %v1631_v48 = vpop.eup %1630 }
 0x375   : > { %v766_v56 = vadd.f32 %v1607_v7, %v765_v54  ;;  %v1633_v34 = vpop.eup %1632 }
 0x376   : > { %v1635_v27 = vpop.eup %1634  ;;  %v799_v41 = vpack.c.bf16 %v1633_v34, %v1631_v48 }
 0x377   : > { %v767_v9 = vadd.f32 %v1609_v8, %v766_v56  ;;  %830 = vmatpush.bf16.msra.mxu3 %v793_v59  ;;  %v1637_v36 = vpop.eup %1636 }
 0x378   : > { %v1639_v38 = vpop.eup %1638  ;;  %v800_v57 = vpack.c.bf16 %v1637_v36, %v1635_v27 }
 0x379   : > { %v768_v7 = vadd.f32 %v2221_v63, %v767_v9  ;;  %v1641_v45 = vpop.eup %1640 }
 0x37a   : > { %v1643_v18 = vpop.eup %1642  ;;  %v805_v62 = vpack.c.bf16 %v1641_v45, %v1639_v38 }
 0x37b   : > { %v769_v8 = vadd.f32 %v1629_v32, %v768_v7  ;;  %831 = vmatpush.bf16.msra.mxu3 %v792_v33  ;;  %v1645_v20 = vpop.eup %1644 }
 0x37c   : > { %v1647_v51 = vpop.eup %1646  ;;  %v801_v56 = vpack.c.bf16 %v1645_v20, %v1643_v18 }
 0x37d   : > { %v770_v10 = vadd.f32 %v1631_v48, %v769_v8  ;;  %v1649_v53 = vpop.eup %1648 }
 0x37e   : > { %v802_v11 = vpack.c.bf16 %v1649_v53, %v1647_v51 }
 0x37f   : > { %v771_v46 = vadd.f32 %v1633_v34, %v770_v10  ;;  %832 = vmatpush.bf16.msra.mxu3 %v791_v14  ;;  %v2270_v14 = vpop.f32.mrf.mxu0 }
 0x381   : > { %v772_v40 = vadd.f32 %v1635_v27, %v771_v46 }
 0x383   : > { %v773_v23 = vadd.f32 %v1637_v36, %v772_v40  ;;  %833 = vmatpush.bf16.msra.mxu3 %v790_v61 }
 0x385   : > { %v774_v60 = vadd.f32 %v1643_v18, %v773_v23  ;;  %v2581_v23 = vld [vmem:[#allocation6_spill] sm:$0xff] }
 0x386   : > { %834 = vmatmul.bf16.vlgmr.msra.gmra.mxu3 %v1986_v2 }
 0x387   : > { %v775_v52 = vadd.f32 %v1645_v20, %v774_v60  ;;  %845 = vmatpush.bf16.msrb.mxu3 %v805_v62  ;;  %v2276_v60 = vpop.f32.mrf.mxu0 }
 0x389   : > { %v776_v0 = vadd.f32 %v1647_v51, %v775_v52 }
 0x38b   : > { %v777_v13 = vadd.f32 %v1649_v53, %v776_v0  ;;  %846 = vmatpush.bf16.msrb.mxu3 %v804_v58 }
 0x38d   : > { %v778_v37 = vadd.f32 %v2206_v44, %v777_v13  ;;  %v798_v44 = vpack.c.bf16 %v1629_v32, %v2221_v63 }
 0x38f   : > { %v779_v1 = vadd.f32 %v2208_v49, %v778_v37  ;;  %847 = vmatpush.bf16.msrb.mxu3 %v803_v47  ;;  %v2280_v61 = vpop.f32.mrf.mxu0 }
 0x391   : > { %v780_v54 = vadd.f32 %v2212_v50, %v779_v1 }
 0x393   : > { %v781_v4 = vadd.f32 %v1625_v42, %v780_v54  ;;  %848 = vmatpush.bf16.msrb.mxu3 %v802_v11 }
 0x395   : > { %v782_v55 = vadd.f32 %v1639_v38, %v781_v4 }
 0x396   : > { %839 = vmatmul.bf16.gmra.mxu3 %v1992_v15 }
 0x397   : > { %v783_v5 = vadd.f32 %v1641_v45, %v782_v55  ;;  %849 = vmatpush.bf16.msrb.mxu3 %v801_v56  ;;  %v2284_v62 = vpop.f32.mrf.mxu0 }
 0x399   : > { %v784_v49 = vrot.slane %v783_v5, 4 }
 0x39b   : > { %850 = vmatpush.bf16.msrb.mxu3 %v800_v57 }
 0x39f   : > { %851 = vmatpush.bf16.msrb.mxu3 %v799_v41  ;;  %v2290_v0 = vpop.f32.mrf.mxu0 }
 0x3a3   : > { %852 = vmatpush.bf16.msrb.mxu3 %v798_v44 }
 0x3a6   : > { %853 = vmatmul.bf16.vlgmr.msrb.gmra.mxu3 %v1988_v3 }
 0x3a7   : > { %1531 = vmatpush.bf16.msra.mxu3 %v1976_v17  ;;  %v785_v17 = vadd.f32 %v784_v49, %v783_v5  ;;  %v2294_v13 = vpop.f32.mrf.mxu0 }
 0x3a9   : > { %v786_v50 = vrot.slane %v785_v17, 2 }
 0x3ab   : > { %1532 = vmatpush.bf16.msra.mxu3 %v1979_v22  ;;  %v787_v22 = vadd.f32 %v786_v50, %v785_v17 }
 0x3ad   : > { %v788_v47 = vrot.slane %v787_v22, 1 }
 0x3af   : > { %v789_v9 = vadd.f32 %v788_v47, %v787_v22  ;;  %v2298_v1 = vpop.f32.mrf.mxu0 }
 0x3b1   : > { %1650 = vrcp.f32 %v789_v9  ;;  %v875_v7 = vand.u32 2147483648, %v789_v9  ;;  %vm869_vm2 = vweird.f32 %v789_v9 }
 0x3b3   : > { %v876_v39 = vor.u32 1.1754944e-38, %v875_v7 }
 0x3b6   : > { %858 = vmatmul.bf16.gmra.mxu3 %v1994_v16 }
 0x3b7   : > { %v1651_v58 = vpop.eup %1650  ;;  %v2302_v11 = vpop.f32.mrf.mxu0 }
 0x3b8   : > { %vm870_vm1 = vweird.f32 %v1651_v58 }
 0x3b9   : > { %vm871_vm3 = vmor %vm869_vm2, %vm870_vm1 }
 0x3bf   : > { %v2308_v56 = vpop.f32.mrf.mxu0 }
 0x3c6   : > { %1471 = vmatmul.msk.bf16.vlgmr.msra.gmra.mxu3 %vm350_vm0, %v2023_v31 }
 0x3c7   : > { %v2312_v57 = vpop.f32.mrf.mxu0 }
 0x3cf   : > { %v2316_v44 = vpop.f32.mrf.mxu0 }
 0x3d6   : > { %1472 = vmatmul.msk.bf16.gmra.mxu3 %vm350_vm0, %v1997_v19  ;;  %v865_v19 = vmul.f32 %v1651_v58, %v789_v9 }
 0x3d7   : > { %v2320_v17 = vpop.f32.mrf.mxu0 }
 0x3d8   : > { %v866_v63 = vsub.f32 1.0, %v865_v19  ;;  %v989_v19 = vmax.f32 %v2280_v61, %v2298_v1 }
 0x3df   : > { %v2326_v47 = vpop.f32.mrf.mxu0 }
 0x3e6   : > { %1473 = vmatmul.msk.bf16.gmra.mxu3 %vm350_vm0, %v2001_v43 }
 0x3f6   : > { %1474 = vmatmul.msk.bf16.gmra.mxu3 %vm350_vm0, %v2005_v21  ;;  %v867_v21 = vmul.f32 %v1651_v58, %v866_v63 }
 0x3f8   : > { %v868_v6 = vadd.f32 %v1651_v58, %v867_v21 }
 0x3fa   : > { %v872_v59 = vsel %vm871_vm3, %v1651_v58, %v868_v6  ;;  %v987_v58 = vmax.f32 %v2270_v14, %v2290_v0 }
 0x3fc   : > { %v991_v21 = vmax.f32 %v987_v58, %v2308_v56 }
 0x406   : > { %1475 = vmatmul.msk.bf16.gmra.mxu3 %vm350_vm0, %v2009_v24  ;;  %v873_v24 = vand.u32 2147483647, %v789_v9  ;;  %v988_v9 = vmax.f32 %v2276_v60, %v2294_v13 }
 0x408   : > { %vm874_vm4 = vcmp.eq.f32.partialorder %v873_v24, 8.507059e+37  ;;  %v992_v63 = vmax.f32 %v988_v9, %v2312_v57 }
 0x409   : > { %v835_v42 = vpop.f32.mrf.mxu3 }
 0x411   : > { %v837_v31 = vpop.f32.mrf.mxu3 }
 0x416   : > { %1476 = vmatmul.msk.bf16.gmra.mxu3 %vm350_vm0, %v2013_v26  ;;  %v877_v26 = vsel %vm874_vm4, %v876_v39, %v872_v59  ;;  %v995_v59 = vmax.f32 %v991_v21, %v2326_v47 }
 0x419   : > { %v840_v43 = vpop.f32.mrf.mxu3 }
 0x421   : > { %v842_v29 = vpop.f32.mrf.mxu3 }
 0x426   : > { %1477 = vmatmul.msk.bf16.gmra.mxu3 %vm350_vm0, %v2017_v28 }
 0x429   : > { %v854_v32 = vpop.f32.mrf.mxu3 }
 0x42a   : > { %v855_v8 = vadd.f32 %v854_v32, %v835_v42 }
 0x42c   : > { %v878_v48 = vmul.f32 %v877_v26, %v855_v8 }
 0x42e   : > { %v882_v12 = vpack.c.bf16 %v878_v48, %v878_v48 }
 0x430   : > { %886 = vst [vmem:[#allocation2] sm:$0xf] %v882_v12 }
 0x431   : > { %v856_v10 = vpop.f32.mrf.mxu3 }
 0x432   : > { %v857_v33 = vadd.f32 %v856_v10, %v837_v31  ;;  %v2332_v31 = vpop.f32.mrf.mxu0 }
 0x433   : > { %v996_v7 = vmax.f32 %v992_v63, %v2332_v31 }
 0x434   : > { %v879_v34 = vmul.f32 %v877_v26, %v857_v33 }
 0x436   : > { %v883_v25 = vpack.c.bf16 %v879_v34, %v879_v34  ;;  %1478 = vmatmul.msk.bf16.gmra.mxu3 %vm350_vm0, %v2021_v30 }
 0x438   : > { %887 = vst [vmem:[#allocation2 + $0x8] sm:$0xf] %v883_v25 }
 0x439   : > { %v859_v28 = vpop.f32.mrf.mxu3 }
 0x43a   : > { %v860_v46 = vadd.f32 %v859_v28, %v840_v43  ;;  %v990_v43 = vmax.f32 %v2284_v62, %v2302_v11 }
 0x43c   : > { %v880_v27 = vmul.f32 %v877_v26, %v860_v46  ;;  %v994_v6 = vmax.f32 %v990_v43, %v2320_v17 }
 0x43e   : > { %v884_v35 = vpack.c.bf16 %v880_v27, %v880_v27 }
 0x440   : > { %888 = vst [vmem:[#allocation2 + $0x10] sm:$0xf] %v884_v35 }
 0x441   : > { %v861_v36 = vpop.f32.mrf.mxu3 }
 0x442   : > { %v862_v40 = vadd.f32 %v861_v36, %v842_v29  ;;  %v993_v29 = vmax.f32 %v989_v19, %v2316_v44 }
 0x444   : > { %v881_v38 = vmul.f32 %v877_v26, %v862_v40 }
 0x446   : > { %v885_v45 = vpack.c.bf16 %v881_v38, %v881_v38  ;;  %1479 = vmatmul.msk.bf16.gmra.mxu3 %vm350_vm0, %v2581_v23 }
 0x448   : > { %889 = vst [vmem:[#allocation2 + $0x18] sm:$0xf] %v885_v45 }
 0x449   : > { %v2274_v18 = vpop.f32.mrf.mxu3 }
 0x44a   : > { %v997_v32 = vmax.f32 %v993_v29, %v2274_v18 }
 0x451   : > { %v2278_v30 = vpop.f32.mrf.mxu3 }
 0x452   : > { %v998_v39 = vmax.f32 %v994_v6, %v2278_v30 }
 0x459   : > { %v2282_v20 = vpop.f32.mrf.mxu3 }
 0x45a   : > { %v999_v26 = vmax.f32 %v995_v59, %v2282_v20 }
 0x461   : > { %v2286_v52 = vpop.f32.mrf.mxu3 }
 0x462   : > { %v1000_v8 = vmax.f32 %v996_v7, %v2286_v52 }
 0x469   : > { %v2288_v51 = vpop.f32.mrf.mxu3 }
 0x46a   : > { %v1001_v48 = vmax.f32 %v997_v32, %v2288_v51 }
 0x471   : > { %v2292_v53 = vpop.f32.mrf.mxu3 }
 0x472   : > { %v1002_v12 = vmax.f32 %v998_v39, %v2292_v53 }
 0x479   : > { %v2296_v37 = vpop.f32.mrf.mxu3 }
 0x47a   : > { %v1003_v33 = vmax.f32 %v999_v26, %v2296_v37 }
 0x481   : > { %v2300_v54 = vpop.f32.mrf.mxu3 }
 0x482   : > { %v1004_v10 = vmax.f32 %v1000_v8, %v2300_v54 }
 0x489   : > { %v2304_v4 = vpop.f32.mrf.mxu3 }
 0x48a   : > { %v1005_v34 = vmax.f32 %v1001_v48, %v2304_v4 }
 0x491   : > { %v2306_v55 = vpop.f32.mrf.mxu3 }
 0x492   : > { %v1006_v25 = vmax.f32 %v1002_v12, %v2306_v55 }
 0x499   : > { %v2310_v5 = vpop.f32.mrf.mxu3 }
 0x49a   : > { %v1007_v46 = vmax.f32 %v1003_v33, %v2310_v5 }
 0x4a1   : > { %v2314_v41 = vpop.f32.mrf.mxu3 }
 0x4a2   : > { %v1008_v28 = vmax.f32 %v1004_v10, %v2314_v41 }
 0x4a9   : > { %v2318_v49 = vpop.f32.mrf.mxu3 }
 0x4aa   : > { %v1009_v27 = vmax.f32 %v1005_v34, %v2318_v49 }
 0x4b1   : > { %v2322_v50 = vpop.f32.mrf.mxu3 }
 0x4b2   : > { %v1010_v35 = vmax.f32 %v1006_v25, %v2322_v50 }
 0x4b9   : > { %v2324_v22 = vpop.f32.mrf.mxu3 }
 0x4ba   : > { %v1011_v38 = vmax.f32 %v1007_v46, %v2324_v22 }
 0x4c1   : > { %v2328_v42 = vpop.f32.mrf.mxu3 }
 0x4c2   : > { %v1012_v36 = vmax.f32 %v1008_v28, %v2328_v42 }
 0x4c4   : > { %v1015_v9 = vmax.f32 %v1011_v38, %v1012_v36 }
 0x4c9   : > { %v2345_v24 = vpop.f32.mrf.mxu3 }
 0x4ca   : > { %v1013_v45 = vmax.f32 %v1009_v27, %v2345_v24 }
 0x4d1   : > { %v2363_v40 = vpop.f32.mrf.mxu3 }
 0x4d2   : > { %v1014_v23 = vmax.f32 %v1010_v35, %v2363_v40 }
 0x4d4   : > { %v1016_v58 = vmax.f32 %v1013_v45, %v1014_v23 }
 0x4d6   : > { %v1017_v19 = vmax.f32 %v1015_v9, %v1016_v58 }
 0x4d8   : > { %v1018_v43 = vrot.slane %v1017_v19, 4 }
 0x4da   : > { %v1019_v63 = vmax.f32 %v1017_v19, %v1018_v43 }
 0x4dc   : > { %v1020_v21 = vrot.slane %v1019_v63, 2 }
 0x4de   : > { %v1021_v29 = vmax.f32 %v1019_v63, %v1020_v21 }
 0x4e0   : > { %v1022_v6 = vrot.slane %v1021_v29, 1 }
 0x4e2   : > { %v2368_v7 = vmax.f32 %v1021_v29, %v1022_v6 }
 0x4e4   : > { %v1024_v59 = vsub.f32 %v2270_v14, %v2368_v7  ;;  %v1025_v32 = vsub.f32 %v2276_v60, %v2368_v7  ;;  %v1026_v39 = vsub.f32 %v2280_v61, %v2368_v7  ;;  %v1027_v8 = vsub.f32 %v2284_v62, %v2368_v7 }
 0x4e5   : > { %v1028_v26 = vsub.f32 %v2290_v0, %v2368_v7  ;;  %v1029_v48 = vsub.f32 %v2294_v13, %v2368_v7  ;;  %v1030_v60 = vsub.f32 %v2298_v1, %v2368_v7  ;;  %v1031_v61 = vsub.f32 %v2302_v11, %v2368_v7 }
 0x4e6   : > { %1652 = vpow2.f32 %v1024_v59  ;;  %v1032_v62 = vsub.f32 %v2308_v56, %v2368_v7  ;;  %v1033_v13 = vsub.f32 %v2312_v57, %v2368_v7  ;;  %v1038_v1 = vsub.f32 %v2274_v18, %v2368_v7 }
 0x4e7   : > { %1654 = vpow2.f32 %v1025_v32  ;;  %v1039_v56 = vsub.f32 %v2278_v30, %v2368_v7  ;;  %v1036_v34 = vsub.f32 %v2326_v47, %v2368_v7  ;;  %v1037_v18 = vsub.f32 %v2332_v31, %v2368_v7 }
 0x4e8   : > { %1656 = vpow2.f32 %v1026_v39  ;;  %v1034_v30 = vsub.f32 %v2316_v44, %v2368_v7  ;;  %v1035_v31 = vsub.f32 %v2320_v17, %v2368_v7  ;;  %v1050_v19 = vsub.f32 %v2318_v49, %v2368_v7 }
 0x4e9   : > { %1658 = vpow2.f32 %v1027_v8  ;;  %v1051_v17 = vsub.f32 %v2322_v50, %v2368_v7  ;;  %v1040_v29 = vsub.f32 %v2282_v20, %v2368_v7  ;;  %v1041_v32 = vsub.f32 %v2286_v52, %v2368_v7 }
 0x4ea   : > { %1660 = vpow2.f32 %v1028_v26  ;;  %v1054_v39 = vsub.f32 %v2345_v24, %v2368_v7  ;;  %v1052_v20 = vsub.f32 %v2324_v22, %v2368_v7  ;;  %v1053_v52 = vsub.f32 %v2328_v42, %v2368_v7 }
 0x4eb   : > { %1662 = vpow2.f32 %v1029_v48  ;;  %v1055_v48 = vsub.f32 %v2363_v40, %v2368_v7 }
 0x4ec   : > { %v2382_v14 = vpop.eup %1652  ;;  %1664 = vpow2.f32 %v1030_v60 }
 0x4ed   : > { %v2386_v12 = vpop.eup %1654  ;;  %1666 = vpow2.f32 %v1031_v61  ;;  %v1042_v61 = vsub.f32 %v2288_v51, %v2368_v7 }
 0x4ee   : > { %v1088_v0 = vadd.f32 %v2386_v12, %v2382_v14  ;;  %v2394_v10 = vpop.eup %1656  ;;  %1668 = vpow2.f32 %v1032_v62 }
 0x4ef   : > { %v2401_v11 = vpop.eup %1658  ;;  %1670 = vpow2.f32 %v1033_v13  ;;  %v1044_v13 = vsub.f32 %v2296_v37, %v2368_v7 }
 0x4f0   : > { %v1089_v33 = vadd.f32 %v2394_v10, %v1088_v0  ;;  %v2408_v57 = vpop.eup %1660  ;;  %1672 = vpow2.f32 %v1038_v1  ;;  %v1043_v0 = vsub.f32 %v2292_v53, %v2368_v7  ;;  %v1048_v53 = vsub.f32 %v2310_v5, %v2368_v7 }
 0x4f1   : > { %v2413_v46 = vpop.eup %1662  ;;  %1674 = vpow2.f32 %v1039_v56  ;;  %v1046_v5 = vsub.f32 %v2304_v4, %v2368_v7 }
 0x4f2   : > { %v1090_v25 = vadd.f32 %v2401_v11, %v1089_v33  ;;  %v2417_v27 = vpop.eup %1664  ;;  %1676 = vpow2.f32 %v1036_v34  ;;  %v1045_v34 = vsub.f32 %v2300_v54, %v2368_v7 }
 0x4f3   : > { %v2420_v35 = vpop.eup %1666  ;;  %1678 = vpow2.f32 %v1037_v18 }
 0x4f4   : > { %v1091_v28 = vadd.f32 %v2408_v57, %v1090_v25  ;;  %v1669_v36 = vpop.eup %1668  ;;  %1680 = vpow2.f32 %v1034_v30 }
 0x4f5   : > { %v1671_v45 = vpop.eup %1670  ;;  %1682 = vpow2.f32 %v1035_v31  ;;  %v1128_v31 = vpack.c.bf16 %v2420_v35, %v2417_v27 }
 0x4f6   : > { %v1092_v47 = vadd.f32 %v2413_v46, %v1091_v28  ;;  %v1673_v23 = vpop.eup %1672  ;;  %1684 = vpow2.f32 %v1050_v19  ;;  %v1129_v33 = vpack.c.bf16 %v1671_v45, %v1669_v36  ;;  %v1049_v28 = vsub.f32 %v2314_v41, %v2368_v7 }
 0x4f7   : > { %v1675_v9 = vpop.eup %1674  ;;  %1686 = vpow2.f32 %v1051_v17  ;;  %v1125_v17 = vpack.c.bf16 %v2386_v12, %v2382_v14 }
 0x4f8   : > { %v1093_v38 = vadd.f32 %v2417_v27, %v1092_v47  ;;  %v1677_v58 = vpop.eup %1676  ;;  %v1132_v63 = vpack.c.bf16 %v1675_v9, %v1673_v23  ;;  %1688 = vpow2.f32 %v1040_v29  ;;  %v1127_v27 = vpack.c.bf16 %v2413_v46, %v2408_v57 }
 0x4f9   : > { %v1679_v21 = vpop.eup %1678  ;;  %1690 = vpow2.f32 %v1041_v32 }
 0x4fa   : > { %v1094_v44 = vadd.f32 %v2420_v35, %v1093_v38  ;;  %1141 = vmatpush.bf16.msrb.mxu0 %v1132_v63  ;;  %v1681_v59 = vpop.eup %1680  ;;  %v1131_v8 = vpack.c.bf16 %v1679_v21, %v1677_v58  ;;  %1692 = vpow2.f32 %v1054_v39  ;;  %v1126_v63 = vpack.c.bf16 %v2401_v11, %v2394_v10 }
 0x4fb   : > { %v1683_v26 = vpop.eup %1682  ;;  %1694 = vpow2.f32 %v1055_v48 }
 0x4fc   : > { %v1095_v43 = vadd.f32 %v1669_v36, %v1094_v44  ;;  %v1130_v60 = vpack.c.bf16 %v1683_v26, %v1681_v59  ;;  %v2444_v62 = vpop.eup %1684  ;;  %1696 = vpow2.f32 %v1052_v20  ;;  %v1525_v20 = vld [vmem:[#allocation2 + $0x14] sm:$0xf0] }
 0x4fd   : > { %v2446_v22 = vpop.eup %1686  ;;  %1698 = vpow2.f32 %v1053_v52 }
 0x4fe   : > { %v1096_v6 = vadd.f32 %v1671_v45, %v1095_v43  ;;  %1142 = vmatpush.bf16.msrb.mxu0 %v1131_v8  ;;  %v2450_v42 = vpop.eup %1688  ;;  %v2456_v51 = vpack.c.bf16 %v2446_v22, %v2444_v62  ;;  %1700 = vpow2.f32 %v1042_v61  ;;  %v1047_v45 = vsub.f32 %v2306_v55, %v2368_v7 }
 0x4ff   : > { %v2458_v56 = vpop.eup %1690  ;;  %1702 = vpow2.f32 %v1043_v0 }
 0x500   : > { %v1097_v49 = vadd.f32 %v1681_v59, %v1096_v6  ;;  %v2462_v25 = vpop.eup %1692  ;;  %1704 = vpow2.f32 %v1044_v13 }
 0x501   : > { %v2466_v37 = vpop.eup %1694  ;;  %1706 = vpow2.f32 %v1045_v34 }
 0x502   : > { %v1098_v50 = vadd.f32 %v1683_v26, %v1097_v49  ;;  %1143 = vmatpush.bf16.msrb.mxu0 %v1130_v60  ;;  %v1697_v30 = vpop.eup %1696  ;;  %v1140_v54 = vpack.c.bf16 %v2466_v37, %v2462_v25  ;;  %1708 = vpow2.f32 %v1048_v53  ;;  %v1490_v60 = vld [vmem:[#allocation2] sm:$0xf] }
 0x503   : > { %v1699_v36 = vpop.eup %1698  ;;  %1710 = vpow2.f32 %v1049_v28 }
 0x504   : > { %v1099_v24 = vadd.f32 %v1677_v58, %v1098_v50  ;;  %1533 = vmatpush.bf16.msra.mxu1 %v1140_v54  ;;  %v1701_v41 = vpop.eup %1700  ;;  %v1139_v44 = vpack.c.bf16 %v1699_v36, %v1697_v30  ;;  %1712 = vpow2.f32 %v1046_v5  ;;  %v1498_v50 = vld [vmem:[#allocation2 + $0x10] sm:$0xf] }
 0x505   : > { %v1703_v35 = vpop.eup %1702  ;;  %1714 = vpow2.f32 %v1047_v45  ;;  %v1499_v52 = vor.u32 %v1525_v20, %v1498_v50 }
 0x506   : > { %v1100_v40 = vadd.f32 %v1679_v21, %v1099_v24  ;;  %1144 = vmatpush.bf16.msrb.mxu0 %v1129_v33  ;;  %v1134_v12 = vpack.c.bf16 %v1703_v35, %v1701_v41  ;;  %v1523_v24 = vld [vmem:[#allocation2 + $0x4] sm:$0xf0] }
 0x507   : > { %v1491_v61 = vor.u32 %v1523_v24, %v1490_v60  ;;  %v1721_v60 = vld [vmem:[%s1879_s11 + $0x30] sm:$0xff] }
 0x508   : > { %v1101_v1 = vadd.f32 %v1673_v23, %v1100_v40  ;;  %1534 = vmatpush.bf16.msra.mxu1 %v1139_v44 }
 0x50a   : > { %v1102_v18 = vadd.f32 %v1675_v9, %v1101_v1  ;;  %1145 = vmatpush.bf16.msrb.mxu0 %v1128_v31  ;;  %v1705_v9 = vpop.eup %1704 }
 0x50b   : > { %v1707_v58 = vpop.eup %1706 }
 0x50c   : > { %v1103_v47 = vadd.f32 %v2450_v42, %v1102_v18  ;;  %v1709_v19 = vpop.eup %1708  ;;  %1535 = vmatpush.bf16.msra.mxu1 %v2456_v51  ;;  %v1135_v39 = vpack.c.bf16 %v1707_v58, %v1705_v9 }
 0x50d   : > { %v1711_v55 = vpop.eup %1710 }
 0x50e   : > { %v1104_v38 = vadd.f32 %v2458_v56, %v1103_v47  ;;  %1146 = vmatpush.bf16.msrb.mxu0 %v1127_v27  ;;  %v1713_v21 = vpop.eup %1712  ;;  %v1137_v46 = vpack.c.bf16 %v1711_v55, %v1709_v19 }
 0x50f   : > { %v1715_v29 = vpop.eup %1714 }
 0x510   : > { %v1105_v23 = vadd.f32 %v1701_v41, %v1104_v38  ;;  %1536 = vmatpush.bf16.msra.mxu1 %v1137_v46  ;;  %v1136_v32 = vpack.c.bf16 %v1715_v29, %v1713_v21 }
 0x512   : > { %v1106_v4 = vadd.f32 %v1703_v35, %v1105_v23  ;;  %1147 = vmatpush.bf16.msrb.mxu0 %v1126_v63 }
 0x514   : > { %v1107_v43 = vadd.f32 %v1705_v9, %v1106_v4  ;;  %1537 = vmatpush.bf16.msra.mxu1 %v1136_v32 }
 0x516   : > { %v1108_v7 = vadd.f32 %v1707_v58, %v1107_v43  ;;  %1148 = vmatpush.bf16.msrb.mxu0 %v1125_v17 }
 0x518   : > { %v1109_v57 = vadd.f32 %v1713_v21, %v1108_v7  ;;  %1538 = vmatpush.bf16.msra.mxu1 %v1135_v39 }
 0x519   : > { %1149 = vmatmul.bf16.vlgmr.msrb.gmra.mxu0 %v1986_v2  ;;  %v1133_v2 = vpack.c.bf16 %v2458_v56, %v2450_v42 }
 0x51a   : > { %v1110_v6 = vadd.f32 %v1715_v29, %v1109_v57  ;;  %1160 = vmatpush.bf16.msra.mxu0 %v1140_v54  ;;  %v1220_v57 = vpop.permute.xlu0 %1219  ;;  %v1718_v29 = vld [vmem:[%s1879_s11] sm:$0xff] }
 0x51c   : > { %v1111_v59 = vadd.f32 %v1709_v19, %v1110_v6  ;;  %1539 = vmatpush.bf16.msra.mxu1 %v1134_v12 }
 0x51e   : > { %v1112_v10 = vadd.f32 %v1711_v55, %v1111_v59  ;;  %1161 = vmatpush.bf16.msra.mxu0 %v1139_v44 }
 0x520   : > { %v1113_v11 = vadd.f32 %v2444_v62, %v1112_v10  ;;  %1540 = vmatpush.bf16.msra.mxu1 %v1133_v2  ;;  %v2501_v62 = vld [vmem:[%s2574_s3] sm:$0xff] }
 0x522   : > { %v1114_v49 = vadd.f32 %v2446_v22, %v1113_v11  ;;  %1162 = vmatpush.bf16.msra.mxu0 %v2456_v51  ;;  %v1225_v11 = vpop.permute.xlu1 %1224 }
 0x523   : > { %1173 = vmatmul.bf16.vlgmr.msra.gmra.mxu1 %v1994_v16 }
 0x524   : > { %v1115_v14 = vadd.f32 %v1697_v30, %v1114_v49 }
 0x526   : > { %v1116_v8 = vadd.f32 %v1699_v36, %v1115_v14  ;;  %1163 = vmatpush.bf16.msra.mxu0 %v1137_v46  ;;  %v1719_v14 = vld [vmem:[%s1879_s11 + $0x10] sm:$0xff] }
 0x528   : > { %v1117_v26 = vadd.f32 %v2462_v25, %v1116_v8  ;;  %v1230_v8 = vpop.permute.xlu0 %1229 }
 0x529   : > { %1154 = vmatmul.bf16.gmra.mxu0 %v1992_v15  ;;  %v2508_v15 = vld [vmem:[%s2574_s3 + $0x8] sm:$0xff] }
 0x52a   : > { %v1118_v48 = vadd.f32 %v2466_v37, %v1117_v26  ;;  %1164 = vmatpush.bf16.msra.mxu0 %v1136_v32  ;;  %v1235_v50 = vpop.permute.xlu1 %1234 }
 0x52c   : > { %v1119_v16 = vrot.slane %v1118_v48, 4 }
 0x52e   : > { %1165 = vmatpush.bf16.msra.mxu0 %v1135_v39  ;;  %v1120_v40 = vadd.f32 %v1119_v16, %v1118_v48  ;;  %v1720_v48 = vld [vmem:[%s1879_s11 + $0x20] sm:$0xff] }
 0x530   : > { %v1121_v22 = vrot.slane %v1120_v40, 2 }
 0x532   : > { %1166 = vmatpush.bf16.msra.mxu0 %v1134_v12 }
 0x536   : > { %1167 = vmatpush.bf16.msra.mxu0 %v1133_v2 }
 0x539   : > { %1168 = vmatmul.bf16.vlgmr.msra.gmra.mxu0 %v1988_v3  ;;  %v1122_v3 = vadd.f32 %v1121_v22, %v1120_v40  ;;  %v1722_v40 = vld [vmem:[%s1879_s11 + $0x8] sm:$0xff] }
 0x53a   : > { %1279 = vmatpush.bf16.msrb.mxu0 %v1499_v52 }
 0x53b   : > { %v1123_v0 = vrot.slane %v1122_v3, 1 }
 0x53d   : > { %v1124_v42 = vadd.f32 %v1123_v0, %v1122_v3 }
 0x53e   : > { %1280 = vmatpush.bf16.msrb.mxu0 %v1491_v61 }
 0x53f   : > { %1716 = vrcp.f32 %v1124_v42  ;;  %v1190_v53 = vand.u32 2147483648, %v1124_v42  ;;  %vm1184_vm6 = vweird.f32 %v1124_v42  ;;  %v1188_v18 = vand.u32 2147483647, %v1124_v42 }
 0x541   : > { %v1191_v47 = vor.u32 1.1754944e-38, %v1190_v53  ;;  %vm1189_vm8 = vcmp.eq.f32.partialorder %v1188_v18, 8.507059e+37 }
 0x545   : > { %v1717_v13 = vpop.eup %1716 }
 0x546   : > { %v1180_v1 = vmul.f32 %v1717_v13, %v1124_v42  ;;  %vm1185_vm5 = vweird.f32 %v1717_v13  ;;  %v1723_v42 = vld [vmem:[%s1879_s11 + $0x18] sm:$0xff] }
 0x547   : > { %vm1186_vm7 = vmor %vm1184_vm6, %vm1185_vm5 }
 0x548   : > { %v1181_v33 = vsub.f32 1.0, %v1180_v1 }
 0x549   : > { %1504 = vmatmul.msk.bf16.vlgmr.msrb.gmra.mxu0 %vm350_vm0, %v2501_v62 }
 0x54a   : > { %v1182_v56 = vmul.f32 %v1717_v13, %v1181_v33 }
 0x54c   : > { %v1183_v25 = vadd.f32 %v1717_v13, %v1182_v56 }
 0x54e   : > { %v1187_v37 = vsel %vm1186_vm7, %v1717_v13, %v1183_v25  ;;  %v1725_v25 = vld [vmem:[%s1879_s11 + $0x38] sm:$0xff] }
 0x54f   : > { %v1192_v31 = vsel %vm1189_vm8, %v1191_v47, %v1187_v37 }
 0x559   : > { %1505 = vmatmul.msk.bf16.gmra.mxu0 %vm350_vm0, %v2508_v15 }
 0x596   : > { %v1150_v51 = vpop.f32.mrf.mxu0 }
 0x59e   : > { %v1152_v34 = vpop.f32.mrf.mxu0 }
 0x5a0   : > { %v1174_v28 = vpop.f32.mrf.mxu1 }
 0x5a6   : > { %v1155_v30 = vpop.f32.mrf.mxu0 }
 0x5a7   : > { %v1175_v54 = vadd.f32 %v1174_v28, %v1155_v30 }
 0x5a8   : > { %v1176_v38 = vpop.f32.mrf.mxu1 }
 0x5a9   : > { %v1195_v36 = vmul.f32 %v1192_v31, %v1175_v54 }
 0x5ab   : > { %v1199_v5 = vpack.c.bf16 %v1195_v36, %v1195_v36 }
 0x5ad   : > { %1203 = vst [vmem:[#allocation2 + $0x14] sm:$0xf] %v1199_v5 }
 0x5ae   : > { %v1157_v41 = vpop.f32.mrf.mxu0 }
 0x5af   : > { %v1177_v45 = vadd.f32 %v1176_v38, %v1157_v41 }
 0x5b1   : > { %v1196_v23 = vmul.f32 %v1192_v31, %v1177_v45 }
 0x5b3   : > { %v1200_v44 = vpack.c.bf16 %v1196_v23, %v1196_v23 }
 0x5b4   : > { %v1524_v58 = vld [vmem:[#allocation2 + $0x14] sm:$0xf] }
 0x5b5   : > { %1204 = vst [vmem:[#allocation2 + $0x1c] sm:$0xf] %v1200_v44 }
 0x5b6   : > { %v1169_v27 = vpop.f32.mrf.mxu0 }
 0x5b7   : > { %v1170_v35 = vadd.f32 %v1169_v27, %v1150_v51 }
 0x5b9   : > { %v1193_v9 = vmul.f32 %v1192_v31, %v1170_v35 }
 0x5bb   : > { %v1197_v4 = vpack.c.bf16 %v1193_v9, %v1193_v9 }
 0x5bc   : > { %v1500_v19 = vld [vmem:[#allocation2 + $0x18] sm:$0xf0] }
 0x5bd   : > { %1201 = vst [vmem:[#allocation2 + $0x4] sm:$0xf] %v1197_v4  ;;  %v1503_v43 = vor.u32 %v1524_v58, %v1500_v19 }
 0x5be   : > { %v1171_v63 = vpop.f32.mrf.mxu0 }
 0x5bf   : > { %v1172_v55 = vadd.f32 %v1171_v63, %v1152_v34  ;;  %1298 = vmatpush.bf16.msrb.mxu1 %v1503_v43 }
 0x5c1   : > { %v1194_v7 = vmul.f32 %v1192_v31, %v1172_v55 }
 0x5c3   : > { %v1198_v21 = vpack.c.bf16 %v1194_v7, %v1194_v7 }
 0x5c4   : > { %v1522_v59 = vld [vmem:[#allocation2 + $0x4] sm:$0xf] }
 0x5c5   : > { %1202 = vst [vmem:[#allocation2 + $0xc] sm:$0xf] %v1198_v21 }
 0x5c6   : > { %v1282_v46 = vpop.f32.mrf.mxu0 }
 0x5c7   : > { %v1283_v17 = vadd.f32 %v1282_v46, %v1220_v57 }
 0x5c9   : > { %v1311_v6 = vadd.f32 %v1718_v29, %v1283_v17 }
 0x5cb   : > { %1319 = vst [vmem:[%s2516_s15] sm:$0xff] %v1311_v6 }
 0x5cc   : > { %v1492_v32 = vld [vmem:[#allocation2 + $0x8] sm:$0xf0] }
 0x5cd   : > { %v1495_v10 = vor.u32 %v1522_v59, %v1492_v32 }
 0x5ce   : > { %v1284_v39 = vpop.f32.mrf.mxu0 }
 0x5cf   : > { %v1285_v49 = vadd.f32 %v1284_v39, %v1225_v11  ;;  %1299 = vmatpush.bf16.msrb.mxu1 %v1495_v10 }
 0x5d1   : > { %v1313_v12 = vadd.f32 %v1719_v14, %v1285_v49 }
 0x5d2   : > { %1506 = vmatmul.msk.bf16.vlgmr.msrb.gmra.mxu1 %vm350_vm0, %v2501_v62 }
 0x5d3   : > { %1321 = vst [vmem:[%s2516_s15 + $0x10] sm:$0xff] %v1313_v12 }
 0x5d6   : > { %v1287_v26 = vpop.f32.mrf.mxu0 }
 0x5d7   : > { %v1288_v2 = vadd.f32 %v1287_v26, %v1230_v8 }
 0x5d9   : > { %v1315_v20 = vadd.f32 %v1720_v48, %v1288_v2 }
 0x5db   : > { %1323 = vst [vmem:[%s2516_s15 + $0x20] sm:$0xff] %v1315_v20 }
 0x5de   : > { %v1289_v52 = vpop.f32.mrf.mxu0 }
 0x5df   : > { %v1290_v24 = vadd.f32 %v1289_v52, %v1235_v50 }
 0x5e1   : > { %v1317_v61 = vadd.f32 %v1721_v60, %v1290_v24 }
 0x5e2   : > { %1507 = vmatmul.msk.bf16.gmra.mxu1 %vm350_vm0, %v2508_v15  ;;  %v1724_v15 = vld [vmem:[%s1879_s11 + $0x28] sm:$0xff] }
 0x5e3   : > { %1325 = vst [vmem:[%s2516_s15 + $0x30] sm:$0xff] %v1317_v61 }
 0x64f   : > { %v1301_v62 = vpop.f32.mrf.mxu1 }
 0x650   : > { %v1302_v16 = vadd.f32 %v1301_v62, %v1220_v57 }
 0x652   : > { %v1312_v22 = vadd.f32 %v1722_v40, %v1302_v16 }
 0x654   : > { %1320 = vst [vmem:[%s2516_s15 + $0x8] sm:$0xff] %v1312_v22 }
 0x657   : > { %v1303_v3 = vpop.f32.mrf.mxu1 }
 0x658   : > { %v1304_v0 = vadd.f32 %v1303_v3, %v1225_v11 }
 0x65a   : > { %v1314_v13 = vadd.f32 %v1723_v42, %v1304_v0 }
 0x65c   : > { %1322 = vst [vmem:[%s2516_s15 + $0x18] sm:$0xff] %v1314_v13 }
 0x65f   : > { %v1306_v1 = vpop.f32.mrf.mxu1 }
 0x660   : > { %v1307_v51 = vadd.f32 %v1306_v1, %v1230_v8 }
 0x662   : > { %v1316_v33 = vadd.f32 %v1724_v15, %v1307_v51 }
 0x664   : > { %1324 = vst [vmem:[%s2516_s15 + $0x28] sm:$0xff] %v1316_v33 }
 0x667   : > { %v1308_v56 = vpop.f32.mrf.mxu1 }
 0x668   : > { %v1309_v34 = vadd.f32 %v1308_v56, %v1235_v50 }
 0x66a   : > { %v1318_v53 = vadd.f32 %v1725_v25, %v1309_v34 }
 0x66c   : > { %1326 = vst [vmem:[%s2516_s15 + $0x38] sm:$0xff] %v1318_v53 }
 0x66d   : > { %1753 = shalt.err (!%p1750_p3)
}
 0x66e   : > { %s1791_s11 = smov 256   ;;  %s1792_s13 = smov 16  }
 0x66f   : > { %1541 = dma.vmem_to_hbm [thread:$0]  (%p1861_p5), %s1341_s26, 1024, %s1343_s30, %s1328_s6, %s1791_s11, %s1791_s11, %s1792_s13  }
 0x670 PF: > { %p1547_p4 = scmp.ge.s32.totalorder %s1788_s21, 2  ;;  %s1357_s15 = sand.u32 1, %s1776_s18  }
 0x671   : > { %s1358_s16 = scalar_lea.sflag [#allocation4], %s1357_s15 }
 0x672   : > { %p1544_p7 = pnand %p1547_p4, %p1865_p6 }
 0x674   : > { %p1545_p8 = pneg %p1544_p7 }
 0x676   : > { %1771 = dma.done.wait (%p1545_p8), %s1358_s16, 1024  }
 0x677   : > { %1773 = vsyncadd (%p1545_p8), %s1358_s16, 4294966272  ;;  %p15_p9 = scmp.ge.s32.totalorder %s1848_s24, 4   ;;  %s2582_s18 = smov %s1780_s19 }
 0x678   : > { %s2583_s19 = smov %s1784_s20  ;;  %s2584_s20 = smov %s1859_s27 }
 0x679   : > { %s2585_s21 = smov %s1848_s24  ;;  %17 = sbr.rel (!%p15_p9) target bundleno = 3 (0x3), region = 75 }
 0x67e   :  { %1364 = vsyncpa [#allocation4], 1 }
 0x67f   :  { %1366 = vsyncpa [#allocation4 + $0x1], 1 }

</bundles_post_ra>
